<compile_context>
chip_gen: v6e
topology: v6e:2x2x1
jax: 0.10.0
libtpu: 0.0.40
codegen_flags: <defaults>
</compile_context>

<pallas_src>
import numpy as np
import jax
import jax.numpy as jnp
from jax.experimental import pallas as pl
from jax.experimental.pallas import tpu as pltpu

BN_EPS = 1e-5
INV_SQRT10 = float(1.0 / np.sqrt(10.0))
LANE = 128
SUBLANE = 8


def _round_up(n, m):
    return ((n + m - 1) // m) * m


def _bn_affine(sum_ref, sq_ref, gamma, beta, eps, inv_n):
    """Per-feature (scale, shift) of training-mode BatchNorm from accumulated
    sum / sum-of-squares (biased variance, like torch.nn.BatchNorm1d).
    Note: single-pass E[x^2]-E[x]^2 in f32; max(...,0) guards cancellation."""
    mean = sum_ref[...] * inv_n
    var = jnp.maximum(sq_ref[...] * inv_n - mean * mean, 0.0)
    scale = gamma * jax.lax.rsqrt(var + eps)
    shift = beta - mean * scale
    return scale, shift


def _make_kernel(tile_b, nb, enc_p, size_p, n_valid, has_pad):
    inv_n = float(1.0 / n_valid)
    eps12 = 10.0 * BN_EPS   # dropped /sqrt(10) shifts eps -> 10*eps (exact)
    eps3 = BN_EPS

    def kernel(x_ref, w1_ref, w2_ref, w3_ref, bn_ref, out_ref,
               s1, q1, s2, q2, s3, q3, h1c, h2c, h3c, xskc):
        s = pl.program_id(0)   # sweep 0..3
        b = pl.program_id(1)   # batch tile

        def accum_masked(h, sum_ref, sq_ref):
            # Padding only exists in the last batch tile; the select is a
            # no-op elsewhere and skipped entirely (Python gate) when B is a
            # multiple of tile_b.
            if has_pad:
                row = jax.lax.broadcasted_iota(jnp.int32, (tile_b, 1), 0) + b * tile_b
                h = jnp.where(row < n_valid, h, 0.0)
            sum_ref[...] += jnp.sum(h, axis=0, keepdims=True)
            sq_ref[...] += jnp.sum(h * h, axis=0, keepdims=True)

        @pl.when(jnp.logical_and(s == 0, b == 0))
        def _():
            for r in (s1, q1, s2, q2, s3, q3):
                r[...] = jnp.zeros_like(r)

        # ---- sweep 0: layer1 matmul, cache h1 and tanh(x), stats1 ----
        @pl.when(s == 0)
        def _():
            x = x_ref[...]                                    # (tile_b, size_p) f32
            h1 = jnp.dot(x.astype(jnp.bfloat16), w1_ref[...],
                         preferred_element_type=jnp.float32)
            h1c[b] = h1
            xskc[b] = jnp.tanh(x)
            # Padded x rows are exactly zero -> h1 rows are zero -> they add
            # nothing to sum / sum-of-squares: no masking needed here.
            s1[...] += jnp.sum(h1, axis=0, keepdims=True)
            q1[...] += jnp.sum(h1 * h1, axis=0, keepdims=True)

        # ---- sweep 1: bn1 + tanh from cached h1, layer2 matmul, stats2 ----
        @pl.when(s == 1)
        def _():
            sc, sh = _bn_affine(s1, q1, bn_ref[0:1, 0:enc_p], bn_ref[1:2, 0:enc_p],
                                eps12, inv_n)
            o1 = jnp.tanh(h1c[b] * sc + sh)
            h2 = jnp.dot(o1.astype(jnp.bfloat16), w2_ref[...],
                         preferred_element_type=jnp.float32)
            h2c[b] = h2
            accum_masked(h2, s2, q2)

        # ---- sweep 2: bn2 + tanh from cached h2, layer3 matmul, stats3 ----
        @pl.when(s == 2)
        def _():
            sc, sh = _bn_affine(s2, q2, bn_ref[2:3, 0:enc_p], bn_ref[3:4, 0:enc_p],
                                eps12, inv_n)
            o2 = jnp.tanh(h2c[b] * sc + sh)
            h3 = jnp.dot(o2.astype(jnp.bfloat16), w3_ref[...],
                         preferred_element_type=jnp.float32)
            h3c[b] = h3
            accum_masked(h3, s3, q3)

        # ---- sweep 3: bn3, residual skip, output ----
        @pl.when(s == 3)
        def _():
            sc, sh = _bn_affine(s3, q3, bn_ref[4:5, :], bn_ref[5:6, :], eps3, inv_n)
            out_ref[...] = jnp.tanh(h3c[b] * sc + sh + xskc[b])

    return kernel


def prepare_params(params, size, N):
    """One-time padding/packing of the weights and BN params (hoisted out of
    the per-call path).  Linear biases are dropped on purpose: they cancel
    exactly under training-mode BN mean subtraction."""
    enc = size // N
    size_p = _round_up(size, LANE)
    enc_p = _round_up(enc, LANE)
    f32, bf16 = jnp.float32, jnp.bfloat16

    w1p = jnp.zeros((size_p, enc_p), bf16).at[:size, :enc].set(params["w1_t"].astype(bf16))
    w2p = jnp.zeros((enc_p, enc_p), bf16).at[:enc, :enc].set(params["w2_t"].astype(bf16))
    w3p = jnp.zeros((enc_p, size_p), bf16).at[:enc, :size].set(params["w3_t"].astype(bf16))

    # Packed BN params, one lane-dense (8, size_p) array:
    # rows = [g1, be1, g2, be2, g3, be3, 0, 0].
    bn = jnp.zeros((SUBLANE, size_p), f32)
    bn = bn.at[0, :enc].set(params["g1"].reshape(-1).astype(f32))
    bn = bn.at[1, :enc].set(params["be1"].reshape(-1).astype(f32))
    bn = bn.at[2, :enc].set(params["g2"].reshape(-1).astype(f32))
    bn = bn.at[3, :enc].set(params["be2"].reshape(-1).astype(f32))
    bn = bn.at[4, :size].set(params["g3"].reshape(-1).astype(f32))
    bn = bn.at[5, :size].set(params["be3"].reshape(-1).astype(f32))

    return dict(w1p=w1p, w2p=w2p, w3p=w3p, bn=bn,
                size=size, enc=enc, size_p=size_p, enc_p=enc_p)


def res_bottle_forward(x, prepped, *, tile_b=1024):
    """x: (B, size) f32.  prepped: see prepare_params.  Returns (B, size) f32."""
    B, size = x.shape
    assert size == prepped["size"]
    size_p, enc_p = prepped["size_p"], prepped["enc_p"]
    f32 = jnp.float32

    tile_b = _round_up(max(SUBLANE, min(tile_b, _round_up(B, SUBLANE))), SUBLANE)
    B_p = _round_up(B, tile_b)
    nb = B_p // tile_b
    has_pad = B_p != B
    last_b = nb - 1

    if (B_p, size_p) != (B, size):
        xp = jnp.zeros((B_p, size_p), f32).at[:B, :size].set(x.astype(f32))
    else:
        xp = x.astype(f32)

    kernel = _make_kernel(tile_b, nb, enc_p, size_p, B, has_pad)

    # VMEM budget from real buffer sizes (caches scale with B_p).
    cache_bytes = B_p * (2 * enc_p + 2 * size_p) * 4          # h1,h2 / h3,tanh(x)
    stats_bytes = (4 * enc_p + 2 * size_p) * 4
    io_bytes = 2 * 2 * tile_b * size_p * 4                    # x + out, double-buffered
    weight_bytes = 2 * (size_p * enc_p + enc_p * enc_p + enc_p * size_p) * 2
    bn_bytes = 2 * SUBLANE * size_p * 4
    need = cache_bytes + stats_bytes + io_bytes + weight_bytes + bn_bytes
    vmem_limit = int(min(max(int(1.25 * need) + (4 << 20), 16 << 20), 100 << 20))
    # TODO(synk): for very large B the batch-resident caches can exceed v7x's
    # 64 MiB VMEM; chunk B at the wrapper level in that regime.

    # TODO(synk): training-mode batch statistics force sequential ("arbitrary")
    # accumulation on one TensorCore; a v7x dual-TC version needs per-core
    # partial sums combined via VMEM_SHARED/CMEM + core_barrier per sweep.
    out_p = pl.pallas_call(
        kernel,
        out_shape=jax.ShapeDtypeStruct((B_p, size_p), f32),
        grid_spec=pltpu.PrefetchScalarGridSpec(
            num_scalar_prefetch=0,
            grid=(4, nb),                                     # (sweep, batch tile)
            in_specs=[
                # x is only read in sweep 0; pinning the index elsewhere means
                # exactly one DMA per batch tile (no re-reads in sweeps 1-3).
                pl.BlockSpec((tile_b, size_p),
                             lambda s, b: (jnp.where(s == 0, b, last_b), 0)),
                pl.BlockSpec((size_p, enc_p), lambda s, b: (0, 0)),     # W1 (bf16)
                pl.BlockSpec((enc_p, enc_p), lambda s, b: (0, 0)),      # W2 (bf16)
                pl.BlockSpec((enc_p, size_p), lambda s, b: (0, 0)),     # W3 (bf16)
                pl.BlockSpec((SUBLANE, size_p), lambda s, b: (0, 0)),   # packed BN params
            ],
            # out is only written in sweep 3; pinning the index in sweeps 0-2
            # removes the dead writebacks of uninitialized tiles.
            out_specs=pl.BlockSpec((tile_b, size_p),
                                   lambda s, b: (jnp.where(s == 3, b, 0), 0)),
            scratch_shapes=[
                pltpu.VMEM((1, enc_p), f32), pltpu.VMEM((1, enc_p), f32),    # layer1 sum/sq
                pltpu.VMEM((1, enc_p), f32), pltpu.VMEM((1, enc_p), f32),    # layer2 sum/sq
                pltpu.VMEM((1, size_p), f32), pltpu.VMEM((1, size_p), f32),  # layer3 sum/sq
                pltpu.VMEM((nb, tile_b, enc_p), f32),    # h1 cache (pre-activations)
                pltpu.VMEM((nb, tile_b, enc_p), f32),    # h2 cache
                pltpu.VMEM((nb, tile_b, size_p), f32),   # h3 cache
                pltpu.VMEM((nb, tile_b, size_p), f32),   # tanh(x) skip cache
            ],
        ),
        compiler_params=pltpu.CompilerParams(
            dimension_semantics=("arbitrary", "arbitrary"),
            vmem_limit_bytes=vmem_limit,
        ),
    )(xp, prepped["w1p"], prepped["w2p"], prepped["w3p"], prepped["bn"])

    if (B_p, size_p) != (B, size):
        return out_p[:B, :size]
    return out_p


def init_params(key, size, N):
    """Deterministic synthetic parameters matching ResBottle(size, N) shapes."""
    enc = size // N
    ks = jax.random.split(key, 9)

    def lin(kw, kb, fan_in, fan_out):
        bound = 1.0 / np.sqrt(fan_in)   # PyTorch Linear default init
        w = jax.random.uniform(kw, (fan_out, fan_in), jnp.float32, -bound, bound)
        b = jax.random.uniform(kb, (fan_out,), jnp.float32, -bound, bound)
        return w.T, b.reshape(1, fan_out)

    w1_t, b1 = lin(ks[0], ks[1], size, enc)
    w2_t, b2 = lin(ks[2], ks[3], enc, enc)
    w3_t, b3 = lin(ks[4], ks[5], enc, size)

    g1 = (1.0 + 0.1 * jax.random.normal(ks[6], (enc,))).reshape(1, enc).astype(jnp.float32)
    g2 = (1.0 + 0.1 * jax.random.normal(ks[7], (enc,))).reshape(1, enc).astype(jnp.float32)
    g3 = (1.0 + 0.1 * jax.random.normal(ks[8], (size,))).reshape(1, size).astype(jnp.float32)
    be1 = jnp.full((1, enc), 0.01, jnp.float32)
    be2 = jnp.full((1, enc), -0.02, jnp.float32)
    be3 = jnp.full((1, size), 0.03, jnp.float32)

    return dict(w1_t=w1_t, b1=b1, g1=g1, be1=be1,
                w2_t=w2_t, b2=b2, g2=g2, be2=be2,
                w3_t=w3_t, b3=b3, g3=g3, be3=be3)


def res_bottle_reference(x, p):
    """Faithful f32 reference of the PyTorch forward (training-mode BN, biases, /sqrt(10))."""
    def bn(h, g, be):
        m = h.mean(0, keepdims=True)
        v = ((h - m) ** 2).mean(0, keepdims=True)
        return (h - m) / jnp.sqrt(v + BN_EPS) * g + be

    x_skip = jnp.tanh(x)
    o1 = jnp.tanh(bn((x @ p["w1_t"] + p["b1"]) * INV_SQRT10, p["g1"], p["be1"]))
    o2 = jnp.tanh(bn((o1 @ p["w2_t"] + p["b2"]) * INV_SQRT10, p["g2"], p["be2"]))
    o3 = bn(o2 @ p["w3_t"] + p["b3"], p["g3"], p["be3"])
    return jnp.tanh(o3 + x_skip)


def res_bottle_reference_bf16(x, p):
    """Reference mirroring the kernel's numerics (bf16 matmuls, bias/scale
    folded into BN with eps -> 10*eps)."""
    def mm(a, w):
        return jnp.dot(a.astype(jnp.bfloat16), w.astype(jnp.bfloat16),
                       preferred_element_type=jnp.float32)

    def bn(h, g, be, eps):
        inv_n = 1.0 / h.shape[0]
        m = jnp.sum(h, 0, keepdims=True) * inv_n
        v = jnp.maximum(jnp.sum(h * h, 0, keepdims=True) * inv_n - m * m, 0.0)
        scale = g * jax.lax.rsqrt(v + eps)
        return h * scale + (be - m * scale)

    x_skip = jnp.tanh(x)
    o1 = jnp.tanh(bn(mm(x, p["w1_t"]), p["g1"], p["be1"], 10.0 * BN_EPS))
    o2 = jnp.tanh(bn(mm(o1, p["w2_t"]), p["g2"], p["be2"], 10.0 * BN_EPS))
    o3 = bn(mm(o2, p["w3_t"]), p["g3"], p["be3"], BN_EPS)
    return jnp.tanh(o3 + x_skip)


if __name__ == "__main__":
    size, N, batch = 32, 4, 48          # encoded_size = 8
    key = jax.random.PRNGKey(0)
    kx, kp = jax.random.split(key)

    x = jax.random.normal(kx, (batch, size), jnp.float32)
    params = init_params(kp, size, N)
    prepped = prepare_params(params, size, N)   # one-time padding/packing

    ref_bf16 = np.asarray(res_bottle_reference_bf16(x, params))
    ref_f32 = np.asarray(res_bottle_reference(x, params))
    bf16_budget = float(np.max(np.abs(ref_bf16 - ref_f32)))

    # tile_b=32 exercises the multi-tile path (2 tiles, last one padded+masked);
    # the default exercises the single-tile grid=(4,1) fast path.
    for tb in (32, 1024):
        out = jax.block_until_ready(res_bottle_forward(x, prepped, tile_b=tb))
        out_np = np.asarray(out)

        # Tight structural check vs. a reference mirroring the kernel numerics.
        np.testing.assert_allclose(out_np, ref_bf16, rtol=1e-3, atol=1e-3)
        # Faithfulness check vs. the exact f32 PyTorch-semantics reference.
        assert float(np.max(np.abs(out_np - ref_f32))) <= bf16_budget + 1e-3

    print("KERNEL_OK")
</pallas_src>

<mosaic_0001>
module attributes {stable_mosaic.version = 11 : i64} {
  func.func @kernel(%arg0: i32, %arg1: i32, %arg2: memref<32x128xf32, #tpu.memory_space<vmem>>, %arg3: memref<128x128xbf16, #tpu.memory_space<vmem>>, %arg4: memref<128x128xbf16, #tpu.memory_space<vmem>>, %arg5: memref<128x128xbf16, #tpu.memory_space<vmem>>, %arg6: memref<8x128xf32, #tpu.memory_space<vmem>>, %arg7: memref<32x128xf32, #tpu.memory_space<vmem>>, %arg8: memref<1x128xf32, #tpu.memory_space<vmem>>, %arg9: memref<1x128xf32, #tpu.memory_space<vmem>>, %arg10: memref<1x128xf32, #tpu.memory_space<vmem>>, %arg11: memref<1x128xf32, #tpu.memory_space<vmem>>, %arg12: memref<1x128xf32, #tpu.memory_space<vmem>>, %arg13: memref<1x128xf32, #tpu.memory_space<vmem>>, %arg14: memref<2x32x128xf32, #tpu.memory_space<vmem>>, %arg15: memref<2x32x128xf32, #tpu.memory_space<vmem>>, %arg16: memref<2x32x128xf32, #tpu.memory_space<vmem>>, %arg17: memref<2x32x128xf32, #tpu.memory_space<vmem>>) attributes {dimension_semantics = [#tpu.dimension_semantics<arbitrary>, #tpu.dimension_semantics<arbitrary>], iteration_bounds = array<i64: 4, 2>, scalar_prefetch = 0 : i64, scratch_operands = 10 : i64, tpu.core_type = #tpu.core_type<tc>, window_params = [{transform_indices = @transform_0, window_bounds = array<i64: 32, 128>}, {pipeline_mode = #tpu.pipeline_mode<synchronous>, transform_indices = @transform_1, window_bounds = array<i64: 128, 128>}, {pipeline_mode = #tpu.pipeline_mode<synchronous>, transform_indices = @transform_2, window_bounds = array<i64: 128, 128>}, {pipeline_mode = #tpu.pipeline_mode<synchronous>, transform_indices = @transform_3, window_bounds = array<i64: 128, 128>}, {pipeline_mode = #tpu.pipeline_mode<synchronous>, transform_indices = @transform_4, window_bounds = array<i64: 8, 128>}, {transform_indices = @transform_5, window_bounds = array<i64: 32, 128>}]} {
    %c0_i32 = arith.constant 0 : i32
    %0 = arith.cmpi eq, %arg0, %c0_i32 : i32
    %c0_i32_0 = arith.constant 0 : i32
    %1 = arith.cmpi eq, %arg1, %c0_i32_0 : i32
    %2 = arith.andi %0, %1 : i1
    %3 = arith.extui %2 : i1 to i32
    %c0_i32_1 = arith.constant 0 : i32
    %4 = arith.cmpi ne, %3, %c0_i32_1 : i32
    scf.if %4 {
      %cst = arith.constant 0.000000e+00 : f32
      %17 = vector.broadcast %cst : f32 to vector<1x128xf32>
      %c0 = arith.constant 0 : index
      %c0_7 = arith.constant 0 : index
      %18 = vector.load %arg8[%c0, %c0_7] : memref<1x128xf32, #tpu.memory_space<vmem>>, vector<1x128xf32>
      tpu.vector_store %arg8[%c0, %c0_7], %17 {strides = array<i32>} : memref<1x128xf32, #tpu.memory_space<vmem>>, vector<1x128xf32>,
      %cst_8 = arith.constant 0.000000e+00 : f32
      %19 = vector.broadcast %cst_8 : f32 to vector<1x128xf32>
      %c0_9 = arith.constant 0 : index
      %c0_10 = arith.constant 0 : index
      %20 = vector.load %arg9[%c0_9, %c0_10] : memref<1x128xf32, #tpu.memory_space<vmem>>, vector<1x128xf32>
      tpu.vector_store %arg9[%c0_9, %c0_10], %19 {strides = array<i32>} : memref<1x128xf32, #tpu.memory_space<vmem>>, vector<1x128xf32>,
      %cst_11 = arith.constant 0.000000e+00 : f32
      %21 = vector.broadcast %cst_11 : f32 to vector<1x128xf32>
      %c0_12 = arith.constant 0 : index
      %c0_13 = arith.constant 0 : index
      %22 = vector.load %arg10[%c0_12, %c0_13] : memref<1x128xf32, #tpu.memory_space<vmem>>, vector<1x128xf32>
      tpu.vector_store %arg10[%c0_12, %c0_13], %21 {strides = array<i32>} : memref<1x128xf32, #tpu.memory_space<vmem>>, vector<1x128xf32>,
      %cst_14 = arith.constant 0.000000e+00 : f32
      %23 = vector.broadcast %cst_14 : f32 to vector<1x128xf32>
      %c0_15 = arith.constant 0 : index
      %c0_16 = arith.constant 0 : index
      %24 = vector.load %arg11[%c0_15, %c0_16] : memref<1x128xf32, #tpu.memory_space<vmem>>, vector<1x128xf32>
      tpu.vector_store %arg11[%c0_15, %c0_16], %23 {strides = array<i32>} : memref<1x128xf32, #tpu.memory_space<vmem>>, vector<1x128xf32>,
      %cst_17 = arith.constant 0.000000e+00 : f32
      %25 = vector.broadcast %cst_17 : f32 to vector<1x128xf32>
      %c0_18 = arith.constant 0 : index
      %c0_19 = arith.constant 0 : index
      %26 = vector.load %arg12[%c0_18, %c0_19] : memref<1x128xf32, #tpu.memory_space<vmem>>, vector<1x128xf32>
      tpu.vector_store %arg12[%c0_18, %c0_19], %25 {strides = array<i32>} : memref<1x128xf32, #tpu.memory_space<vmem>>, vector<1x128xf32>,
      %cst_20 = arith.constant 0.000000e+00 : f32
      %27 = vector.broadcast %cst_20 : f32 to vector<1x128xf32>
      %c0_21 = arith.constant 0 : index
      %c0_22 = arith.constant 0 : index
      %28 = vector.load %arg13[%c0_21, %c0_22] : memref<1x128xf32, #tpu.memory_space<vmem>>, vector<1x128xf32>
      tpu.vector_store %arg13[%c0_21, %c0_22], %27 {strides = array<i32>} : memref<1x128xf32, #tpu.memory_space<vmem>>, vector<1x128xf32>,
    } else {
    }
    %c0_i32_2 = arith.constant 0 : i32
    %5 = arith.cmpi eq, %arg0, %c0_i32_2 : i32
    %6 = arith.extui %5 : i1 to i32
    %c0_i32_3 = arith.constant 0 : i32
    %7 = arith.cmpi ne, %6, %c0_i32_3 : i32
    scf.if %7 {
      %c0 = arith.constant 0 : index
      %c0_7 = arith.constant 0 : index
      %17 = vector.load %arg2[%c0, %c0_7] : memref<32x128xf32, #tpu.memory_space<vmem>>, vector<32x128xf32>
      %18 = arith.truncf %17 : vector<32x128xf32> to vector<32x128xbf16>
      %c0_8 = arith.constant 0 : index
      %c0_9 = arith.constant 0 : index
      %19 = vector.load %arg3[%c0_8, %c0_9] : memref<128x128xbf16, #tpu.memory_space<vmem>>, vector<128x128xbf16>
      %cst = arith.constant dense<0.000000e+00> : vector<32x128xf32>
      %20 = tpu.matmul %18, %19, %cst {dimension_numbers = #tpu.dot_dimension_numbers<[1], [0], [0], [1], [0, 0, 1, 1], [], []>} : vector<32x128xbf16>, vector<128x128xbf16>, vector<32x128xf32> -> vector<32x128xf32>
      %21 = arith.index_cast %arg1 : i32 to index
      %c0_10 = arith.constant 0 : index
      %c0_11 = arith.constant 0 : index
      %22 = vector.load %arg14[%21, %c0_10, %c0_11] : memref<2x32x128xf32, #tpu.memory_space<vmem>>, vector<1x32x128xf32>
      %23 = vector.shape_cast %22 : vector<1x32x128xf32> to vector<32x128xf32>
      %24 = vector.shape_cast %20 : vector<32x128xf32> to vector<1x32x128xf32>
      tpu.vector_store %arg14[%21, %c0_10, %c0_11], %24 {strides = array<i32>} : memref<2x32x128xf32, #tpu.memory_space<vmem>>, vector<1x32x128xf32>,
      %25 = math.tanh %17 : vector<32x128xf32>
      %26 = arith.index_cast %arg1 : i32 to index
      %c0_12 = arith.constant 0 : index
      %c0_13 = arith.constant 0 : index
      %27 = vector.load %arg17[%26, %c0_12, %c0_13] : memref<2x32x128xf32, #tpu.memory_space<vmem>>, vector<1x32x128xf32>
      %28 = vector.shape_cast %27 : vector<1x32x128xf32> to vector<32x128xf32>
      %29 = vector.shape_cast %25 : vector<32x128xf32> to vector<1x32x128xf32>
      tpu.vector_store %arg17[%26, %c0_12, %c0_13], %29 {strides = array<i32>} : memref<2x32x128xf32, #tpu.memory_space<vmem>>, vector<1x32x128xf32>,
      %c0_14 = arith.constant 0 : index
      %c0_15 = arith.constant 0 : index
      %30 = vector.load %arg8[%c0_14, %c0_15] : memref<1x128xf32, #tpu.memory_space<vmem>>, vector<1x128xf32>
      %cst_16 = arith.constant dense<0.000000e+00> : vector<128xf32>
      %31 = vector.multi_reduction <add>, %20, %cst_16 [0] : vector<32x128xf32> to vector<128xf32>
      %32 = vector.shape_cast %31 : vector<128xf32> to vector<1x128xf32>
      %33 = arith.addf %30, %32 : vector<1x128xf32>
      %c0_17 = arith.constant 0 : index
      %c0_18 = arith.constant 0 : index
      %34 = vector.load %arg8[%c0_17, %c0_18] : memref<1x128xf32, #tpu.memory_space<vmem>>, vector<1x128xf32>
      tpu.vector_store %arg8[%c0_17, %c0_18], %33 {strides = array<i32>} : memref<1x128xf32, #tpu.memory_space<vmem>>, vector<1x128xf32>,
      %c0_19 = arith.constant 0 : index
      %c0_20 = arith.constant 0 : index
      %35 = vector.load %arg9[%c0_19, %c0_20] : memref<1x128xf32, #tpu.memory_space<vmem>>, vector<1x128xf32>
      %36 = arith.mulf %20, %20 : vector<32x128xf32>
      %cst_21 = arith.constant dense<0.000000e+00> : vector<128xf32>
      %37 = vector.multi_reduction <add>, %36, %cst_21 [0] : vector<32x128xf32> to vector<128xf32>
      %38 = vector.shape_cast %37 : vector<128xf32> to vector<1x128xf32>
      %39 = arith.addf %35, %38 : vector<1x128xf32>
      %c0_22 = arith.constant 0 : index
      %c0_23 = arith.constant 0 : index
      %40 = vector.load %arg9[%c0_22, %c0_23] : memref<1x128xf32, #tpu.memory_space<vmem>>, vector<1x128xf32>
      tpu.vector_store %arg9[%c0_22, %c0_23], %39 {strides = array<i32>} : memref<1x128xf32, #tpu.memory_space<vmem>>, vector<1x128xf32>,
    } else {
    }
    %c1_i32 = arith.constant 1 : i32
    %8 = arith.cmpi eq, %arg0, %c1_i32 : i32
    %9 = arith.extui %8 : i1 to i32
    %c0_i32_4 = arith.constant 0 : i32
    %10 = arith.cmpi ne, %9, %c0_i32_4 : i32
    scf.if %10 {
      %c0 = arith.constant 0 : index
      %c0_7 = arith.constant 0 : index
      %17 = vector.load %arg6[%c0, %c0_7] : memref<8x128xf32, #tpu.memory_space<vmem>>, vector<1x128xf32>
      %c1 = arith.constant 1 : index
      %c0_8 = arith.constant 0 : index
      %18 = vector.load %arg6[%c1, %c0_8] : memref<8x128xf32, #tpu.memory_space<vmem>>, vector<1x128xf32>
      %c0_9 = arith.constant 0 : index
      %c0_10 = arith.constant 0 : index
      %19 = vector.load %arg8[%c0_9, %c0_10] : memref<1x128xf32, #tpu.memory_space<vmem>>, vector<1x128xf32>
      %cst = arith.constant 0.020833334 : f32
      %20 = vector.broadcast %cst : f32 to vector<1x128xf32>
      %21 = arith.mulf %19, %20 : vector<1x128xf32>
      %c0_11 = arith.constant 0 : index
      %c0_12 = arith.constant 0 : index
      %22 = vector.load %arg9[%c0_11, %c0_12] : memref<1x128xf32, #tpu.memory_space<vmem>>, vector<1x128xf32>
      %cst_13 = arith.constant 0.020833334 : f32
      %23 = vector.broadcast %cst_13 : f32 to vector<1x128xf32>
      %24 = arith.mulf %22, %23 : vector<1x128xf32>
      %25 = arith.mulf %21, %21 : vector<1x128xf32>
      %26 = arith.subf %24, %25 : vector<1x128xf32>
      %cst_14 = arith.constant 0.000000e+00 : f32
      %27 = vector.broadcast %cst_14 : f32 to vector<1x128xf32>
      %28 = arith.maximumf %26, %27 : vector<1x128xf32>
      %cst_15 = arith.constant 9.99999974E-5 : f32
      %29 = vector.broadcast %cst_15 : f32 to vector<1x128xf32>
      %30 = arith.addf %28, %29 : vector<1x128xf32>
      %31 = math.rsqrt %30 : vector<1x128xf32>
      %32 = arith.mulf %17, %31 : vector<1x128xf32>
      %33 = arith.mulf %21, %32 : vector<1x128xf32>
      %34 = arith.subf %18, %33 : vector<1x128xf32>
      %35 = arith.index_cast %arg1 : i32 to index
      %c0_16 = arith.constant 0 : index
      %c0_17 = arith.constant 0 : index
      %36 = vector.load %arg14[%35, %c0_16, %c0_17] : memref<2x32x128xf32, #tpu.memory_space<vmem>>, vector<1x32x128xf32>
      %37 = vector.shape_cast %36 : vector<1x32x128xf32> to vector<32x128xf32>
      %38 = vector.broadcast %32 : vector<1x128xf32> to vector<32x128xf32>
      %39 = arith.mulf %37, %38 : vector<32x128xf32>
      %40 = vector.broadcast %34 : vector<1x128xf32> to vector<32x128xf32>
      %41 = arith.addf %39, %40 : vector<32x128xf32>
      %42 = math.tanh %41 : vector<32x128xf32>
      %43 = arith.truncf %42 : vector<32x128xf32> to vector<32x128xbf16>
      %c0_18 = arith.constant 0 : index
      %c0_19 = arith.constant 0 : index
      %44 = vector.load %arg4[%c0_18, %c0_19] : memref<128x128xbf16, #tpu.memory_space<vmem>>, vector<128x128xbf16>
      %cst_20 = arith.constant dense<0.000000e+00> : vector<32x128xf32>
      %45 = tpu.matmul %43, %44, %cst_20 {dimension_numbers = #tpu.dot_dimension_numbers<[1], [0], [0], [1], [0, 0, 1, 1], [], []>} : vector<32x128xbf16>, vector<128x128xbf16>, vector<32x128xf32> -> vector<32x128xf32>
      %46 = arith.index_cast %arg1 : i32 to index
      %c0_21 = arith.constant 0 : index
      %c0_22 = arith.constant 0 : index
      %47 = vector.load %arg15[%46, %c0_21, %c0_22] : memref<2x32x128xf32, #tpu.memory_space<vmem>>, vector<1x32x128xf32>
      %48 = vector.shape_cast %47 : vector<1x32x128xf32> to vector<32x128xf32>
      %49 = vector.shape_cast %45 : vector<32x128xf32> to vector<1x32x128xf32>
      tpu.vector_store %arg15[%46, %c0_21, %c0_22], %49 {strides = array<i32>} : memref<2x32x128xf32, #tpu.memory_space<vmem>>, vector<1x32x128xf32>,
      %50 = tpu.iota {dimensions = array<i32: 0>} : vector<32x1xi32>
      %c32_i32 = arith.constant 32 : i32
      %51 = arith.muli %arg1, %c32_i32 : i32
      %52 = vector.broadcast %51 : i32 to vector<32x1xi32>
      %53 = arith.addi %50, %52 : vector<32x1xi32>
      %c48_i32 = arith.constant 48 : i32
      %54 = vector.broadcast %c48_i32 : i32 to vector<32x1xi32>
      %55 = arith.cmpi slt, %53, %54 : vector<32x1xi32>
      %cst_23 = arith.constant 0.000000e+00 : f32
      %56 = vector.shape_cast %55 : vector<32x1xi1> to vector<32x1xi1>
      %57 = vector.broadcast %56 : vector<32x1xi1> to vector<32x128xi1>
      %58 = vector.broadcast %cst_23 : f32 to vector<32x128xf32>
      %59 = arith.select %57, %45, %58 : vector<32x128xi1>, vector<32x128xf32>
      %c0_24 = arith.constant 0 : index
      %c0_25 = arith.constant 0 : index
      %60 = vector.load %arg10[%c0_24, %c0_25] : memref<1x128xf32, #tpu.memory_space<vmem>>, vector<1x128xf32>
      %cst_26 = arith.constant dense<0.000000e+00> : vector<128xf32>
      %61 = vector.multi_reduction <add>, %59, %cst_26 [0] : vector<32x128xf32> to vector<128xf32>
      %62 = vector.shape_cast %61 : vector<128xf32> to vector<1x128xf32>
      %63 = arith.addf %60, %62 : vector<1x128xf32>
      %c0_27 = arith.constant 0 : index
      %c0_28 = arith.constant 0 : index
      %64 = vector.load %arg10[%c0_27, %c0_28] : memref<1x128xf32, #tpu.memory_space<vmem>>, vector<1x128xf32>
      tpu.vector_store %arg10[%c0_27, %c0_28], %63 {strides = array<i32>} : memref<1x128xf32, #tpu.memory_space<vmem>>, vector<1x128xf32>,
      %c0_29 = arith.constant 0 : index
      %c0_30 = arith.constant 0 : index
      %65 = vector.load %arg11[%c0_29, %c0_30] : memref<1x128xf32, #tpu.memory_space<vmem>>, vector<1x128xf32>
      %66 = arith.mulf %59, %59 : vector<32x128xf32>
      %cst_31 = arith.constant dense<0.000000e+00> : vector<128xf32>
      %67 = vector.multi_reduction <add>, %66, %cst_31 [0] : vector<32x128xf32> to vector<128xf32>
      %68 = vector.shape_cast %67 : vector<128xf32> to vector<1x128xf32>
      %69 = arith.addf %65, %68 : vector<1x128xf32>
      %c0_32 = arith.constant 0 : index
      %c0_33 = arith.constant 0 : index
      %70 = vector.load %arg11[%c0_32, %c0_33] : memref<1x128xf32, #tpu.memory_space<vmem>>, vector<1x128xf32>
      tpu.vector_store %arg11[%c0_32, %c0_33], %69 {strides = array<i32>} : memref<1x128xf32, #tpu.memory_space<vmem>>, vector<1x128xf32>,
    } else {
    }
    %c2_i32 = arith.constant 2 : i32
    %11 = arith.cmpi eq, %arg0, %c2_i32 : i32
    %12 = arith.extui %11 : i1 to i32
    %c0_i32_5 = arith.constant 0 : i32
    %13 = arith.cmpi ne, %12, %c0_i32_5 : i32
    scf.if %13 {
      %c2 = arith.constant 2 : index
      %c0 = arith.constant 0 : index
      %17 = vector.load %arg6[%c2, %c0] : memref<8x128xf32, #tpu.memory_space<vmem>>, vector<1x128xf32>
      %c3 = arith.constant 3 : index
      %c0_7 = arith.constant 0 : index
      %18 = vector.load %arg6[%c3, %c0_7] : memref<8x128xf32, #tpu.memory_space<vmem>>, vector<1x128xf32>
      %c0_8 = arith.constant 0 : index
      %c0_9 = arith.constant 0 : index
      %19 = vector.load %arg10[%c0_8, %c0_9] : memref<1x128xf32, #tpu.memory_space<vmem>>, vector<1x128xf32>
      %cst = arith.constant 0.020833334 : f32
      %20 = vector.broadcast %cst : f32 to vector<1x128xf32>
      %21 = arith.mulf %19, %20 : vector<1x128xf32>
      %c0_10 = arith.constant 0 : index
      %c0_11 = arith.constant 0 : index
      %22 = vector.load %arg11[%c0_10, %c0_11] : memref<1x128xf32, #tpu.memory_space<vmem>>, vector<1x128xf32>
      %cst_12 = arith.constant 0.020833334 : f32
      %23 = vector.broadcast %cst_12 : f32 to vector<1x128xf32>
      %24 = arith.mulf %22, %23 : vector<1x128xf32>
      %25 = arith.mulf %21, %21 : vector<1x128xf32>
      %26 = arith.subf %24, %25 : vector<1x128xf32>
      %cst_13 = arith.constant 0.000000e+00 : f32
      %27 = vector.broadcast %cst_13 : f32 to vector<1x128xf32>
      %28 = arith.maximumf %26, %27 : vector<1x128xf32>
      %cst_14 = arith.constant 9.99999974E-5 : f32
      %29 = vector.broadcast %cst_14 : f32 to vector<1x128xf32>
      %30 = arith.addf %28, %29 : vector<1x128xf32>
      %31 = math.rsqrt %30 : vector<1x128xf32>
      %32 = arith.mulf %17, %31 : vector<1x128xf32>
      %33 = arith.mulf %21, %32 : vector<1x128xf32>
      %34 = arith.subf %18, %33 : vector<1x128xf32>
      %35 = arith.index_cast %arg1 : i32 to index
      %c0_15 = arith.constant 0 : index
      %c0_16 = arith.constant 0 : index
      %36 = vector.load %arg15[%35, %c0_15, %c0_16] : memref<2x32x128xf32, #tpu.memory_space<vmem>>, vector<1x32x128xf32>
      %37 = vector.shape_cast %36 : vector<1x32x128xf32> to vector<32x128xf32>
      %38 = vector.broadcast %32 : vector<1x128xf32> to vector<32x128xf32>
      %39 = arith.mulf %37, %38 : vector<32x128xf32>
      %40 = vector.broadcast %34 : vector<1x128xf32> to vector<32x128xf32>
      %41 = arith.addf %39, %40 : vector<32x128xf32>
      %42 = math.tanh %41 : vector<32x128xf32>
      %43 = arith.truncf %42 : vector<32x128xf32> to vector<32x128xbf16>
      %c0_17 = arith.constant 0 : index
      %c0_18 = arith.constant 0 : index
      %44 = vector.load %arg5[%c0_17, %c0_18] : memref<128x128xbf16, #tpu.memory_space<vmem>>, vector<128x128xbf16>
      %cst_19 = arith.constant dense<0.000000e+00> : vector<32x128xf32>
      %45 = tpu.matmul %43, %44, %cst_19 {dimension_numbers = #tpu.dot_dimension_numbers<[1], [0], [0], [1], [0, 0, 1, 1], [], []>} : vector<32x128xbf16>, vector<128x128xbf16>, vector<32x128xf32> -> vector<32x128xf32>
      %46 = arith.index_cast %arg1 : i32 to index
      %c0_20 = arith.constant 0 : index
      %c0_21 = arith.constant 0 : index
      %47 = vector.load %arg16[%46, %c0_20, %c0_21] : memref<2x32x128xf32, #tpu.memory_space<vmem>>, vector<1x32x128xf32>
      %48 = vector.shape_cast %47 : vector<1x32x128xf32> to vector<32x128xf32>
      %49 = vector.shape_cast %45 : vector<32x128xf32> to vector<1x32x128xf32>
      tpu.vector_store %arg16[%46, %c0_20, %c0_21], %49 {strides = array<i32>} : memref<2x32x128xf32, #tpu.memory_space<vmem>>, vector<1x32x128xf32>,
      %50 = tpu.iota {dimensions = array<i32: 0>} : vector<32x1xi32>
      %c32_i32 = arith.constant 32 : i32
      %51 = arith.muli %arg1, %c32_i32 : i32
      %52 = vector.broadcast %51 : i32 to vector<32x1xi32>
      %53 = arith.addi %50, %52 : vector<32x1xi32>
      %c48_i32 = arith.constant 48 : i32
      %54 = vector.broadcast %c48_i32 : i32 to vector<32x1xi32>
      %55 = arith.cmpi slt, %53, %54 : vector<32x1xi32>
      %cst_22 = arith.constant 0.000000e+00 : f32
      %56 = vector.shape_cast %55 : vector<32x1xi1> to vector<32x1xi1>
      %57 = vector.broadcast %56 : vector<32x1xi1> to vector<32x128xi1>
      %58 = vector.broadcast %cst_22 : f32 to vector<32x128xf32>
      %59 = arith.select %57, %45, %58 : vector<32x128xi1>, vector<32x128xf32>
      %c0_23 = arith.constant 0 : index
      %c0_24 = arith.constant 0 : index
      %60 = vector.load %arg12[%c0_23, %c0_24] : memref<1x128xf32, #tpu.memory_space<vmem>>, vector<1x128xf32>
      %cst_25 = arith.constant dense<0.000000e+00> : vector<128xf32>
      %61 = vector.multi_reduction <add>, %59, %cst_25 [0] : vector<32x128xf32> to vector<128xf32>
      %62 = vector.shape_cast %61 : vector<128xf32> to vector<1x128xf32>
      %63 = arith.addf %60, %62 : vector<1x128xf32>
      %c0_26 = arith.constant 0 : index
      %c0_27 = arith.constant 0 : index
      %64 = vector.load %arg12[%c0_26, %c0_27] : memref<1x128xf32, #tpu.memory_space<vmem>>, vector<1x128xf32>
      tpu.vector_store %arg12[%c0_26, %c0_27], %63 {strides = array<i32>} : memref<1x128xf32, #tpu.memory_space<vmem>>, vector<1x128xf32>,
      %c0_28 = arith.constant 0 : index
      %c0_29 = arith.constant 0 : index
      %65 = vector.load %arg13[%c0_28, %c0_29] : memref<1x128xf32, #tpu.memory_space<vmem>>, vector<1x128xf32>
      %66 = arith.mulf %59, %59 : vector<32x128xf32>
      %cst_30 = arith.constant dense<0.000000e+00> : vector<128xf32>
      %67 = vector.multi_reduction <add>, %66, %cst_30 [0] : vector<32x128xf32> to vector<128xf32>
      %68 = vector.shape_cast %67 : vector<128xf32> to vector<1x128xf32>
      %69 = arith.addf %65, %68 : vector<1x128xf32>
      %c0_31 = arith.constant 0 : index
      %c0_32 = arith.constant 0 : index
      %70 = vector.load %arg13[%c0_31, %c0_32] : memref<1x128xf32, #tpu.memory_space<vmem>>, vector<1x128xf32>
      tpu.vector_store %arg13[%c0_31, %c0_32], %69 {strides = array<i32>} : memref<1x128xf32, #tpu.memory_space<vmem>>, vector<1x128xf32>,
    } else {
    }
    %c3_i32 = arith.constant 3 : i32
    %14 = arith.cmpi eq, %arg0, %c3_i32 : i32
    %15 = arith.extui %14 : i1 to i32
    %c0_i32_6 = arith.constant 0 : i32
    %16 = arith.cmpi ne, %15, %c0_i32_6 : i32
    scf.if %16 {
      %c4 = arith.constant 4 : index
      %c0 = arith.constant 0 : index
      %17 = vector.load %arg6[%c4, %c0] : memref<8x128xf32, #tpu.memory_space<vmem>>, vector<1x128xf32>
      %c5 = arith.constant 5 : index
      %c0_7 = arith.constant 0 : index
      %18 = vector.load %arg6[%c5, %c0_7] : memref<8x128xf32, #tpu.memory_space<vmem>>, vector<1x128xf32>
      %c0_8 = arith.constant 0 : index
      %c0_9 = arith.constant 0 : index
      %19 = vector.load %arg12[%c0_8, %c0_9] : memref<1x128xf32, #tpu.memory_space<vmem>>, vector<1x128xf32>
      %cst = arith.constant 0.020833334 : f32
      %20 = vector.broadcast %cst : f32 to vector<1x128xf32>
      %21 = arith.mulf %19, %20 : vector<1x128xf32>
      %c0_10 = arith.constant 0 : index
      %c0_11 = arith.constant 0 : index
      %22 = vector.load %arg13[%c0_10, %c0_11] : memref<1x128xf32, #tpu.memory_space<vmem>>, vector<1x128xf32>
      %cst_12 = arith.constant 0.020833334 : f32
      %23 = vector.broadcast %cst_12 : f32 to vector<1x128xf32>
      %24 = arith.mulf %22, %23 : vector<1x128xf32>
      %25 = arith.mulf %21, %21 : vector<1x128xf32>
      %26 = arith.subf %24, %25 : vector<1x128xf32>
      %cst_13 = arith.constant 0.000000e+00 : f32
      %27 = vector.broadcast %cst_13 : f32 to vector<1x128xf32>
      %28 = arith.maximumf %26, %27 : vector<1x128xf32>
      %cst_14 = arith.constant 9.99999974E-6 : f32
      %29 = vector.broadcast %cst_14 : f32 to vector<1x128xf32>
      %30 = arith.addf %28, %29 : vector<1x128xf32>
      %31 = math.rsqrt %30 : vector<1x128xf32>
      %32 = arith.mulf %17, %31 : vector<1x128xf32>
      %33 = arith.mulf %21, %32 : vector<1x128xf32>
      %34 = arith.subf %18, %33 : vector<1x128xf32>
      %35 = arith.index_cast %arg1 : i32 to index
      %c0_15 = arith.constant 0 : index
      %c0_16 = arith.constant 0 : index
      %36 = vector.load %arg16[%35, %c0_15, %c0_16] : memref<2x32x128xf32, #tpu.memory_space<vmem>>, vector<1x32x128xf32>
      %37 = vector.shape_cast %36 : vector<1x32x128xf32> to vector<32x128xf32>
      %38 = vector.broadcast %32 : vector<1x128xf32> to vector<32x128xf32>
      %39 = arith.mulf %37, %38 : vector<32x128xf32>
      %40 = vector.broadcast %34 : vector<1x128xf32> to vector<32x128xf32>
      %41 = arith.addf %39, %40 : vector<32x128xf32>
      %42 = arith.index_cast %arg1 : i32 to index
      %c0_17 = arith.constant 0 : index
      %c0_18 = arith.constant 0 : index
      %43 = vector.load %arg17[%42, %c0_17, %c0_18] : memref<2x32x128xf32, #tpu.memory_space<vmem>>, vector<1x32x128xf32>
      %44 = vector.shape_cast %43 : vector<1x32x128xf32> to vector<32x128xf32>
      %45 = arith.addf %41, %44 : vector<32x128xf32>
      %46 = math.tanh %45 : vector<32x128xf32>
      %c0_19 = arith.constant 0 : index
      %c0_20 = arith.constant 0 : index
      %47 = vector.load %arg7[%c0_19, %c0_20] : memref<32x128xf32, #tpu.memory_space<vmem>>, vector<32x128xf32>
      tpu.vector_store %arg7[%c0_19, %c0_20], %46 {strides = array<i32>} : memref<32x128xf32, #tpu.memory_space<vmem>>, vector<32x128xf32>,
    } else {
    }
    return
  }
  func.func @transform_0(%arg0: i32, %arg1: i32) -> (i32, i32) {
    %c0_i32 = arith.constant 0 : i32
    %0 = arith.cmpi eq, %arg0, %c0_i32 : i32
    %c1_i32 = arith.constant 1 : i32
    %1 = arith.select %0, %arg1, %c1_i32 : i32
    %c0_i32_0 = arith.constant 0 : i32
    %c0_i32_1 = arith.constant 0 : i32
    return %1, %c0_i32_0 : i32, i32
  }
  func.func @transform_1(%arg0: i32, %arg1: i32) -> (i32, i32) {
    %c0_i32 = arith.constant 0 : i32
    %c0_i32_0 = arith.constant 0 : i32
    %c0_i32_1 = arith.constant 0 : i32
    return %c0_i32, %c0_i32_0 : i32, i32
  }
  func.func @transform_2(%arg0: i32, %arg1: i32) -> (i32, i32) {
    %c0_i32 = arith.constant 0 : i32
    %c0_i32_0 = arith.constant 0 : i32
    %c0_i32_1 = arith.constant 0 : i32
    return %c0_i32, %c0_i32_0 : i32, i32
  }
  func.func @transform_3(%arg0: i32, %arg1: i32) -> (i32, i32) {
    %c0_i32 = arith.constant 0 : i32
    %c0_i32_0 = arith.constant 0 : i32
    %c0_i32_1 = arith.constant 0 : i32
    return %c0_i32, %c0_i32_0 : i32, i32
  }
  func.func @transform_4(%arg0: i32, %arg1: i32) -> (i32, i32) {
    %c0_i32 = arith.constant 0 : i32
    %c0_i32_0 = arith.constant 0 : i32
    %c0_i32_1 = arith.constant 0 : i32
    return %c0_i32, %c0_i32_0 : i32, i32
  }
  func.func @transform_5(%arg0: i32, %arg1: i32) -> (i32, i32) {
    %c3_i32 = arith.constant 3 : i32
    %0 = arith.cmpi eq, %arg0, %c3_i32 : i32
    %c0_i32 = arith.constant 0 : i32
    %1 = arith.select %0, %arg1, %c0_i32 : i32
    %c0_i32_0 = arith.constant 0 : i32
    %c0_i32_1 = arith.constant 0 : i32
    return %1, %c0_i32_0 : i32, i32
  }
}

</mosaic_0001>

<bundles_post_ra>
// kernel: tpu_custom_call.1
= control target key start
LH: loop header
LB: loop body
LE: loop exit
PB: predicated region body
PF: predicated region fallthrough
CT: control target
= control target key end

     0   :  { %s2120_s0 = inlined_call_operand.hbm [shape: f32[64,128], index: 0, kind: input, shape index: {}]   ;;  %s2121_s1 = inlined_call_operand.hbm [shape: bf16[128,128], index: 1, kind: input, shape index: {}]   ;;  %s2122_s2 = inlined_call_operand.hbm [shape: bf16[128,128], index: 2, kind: input, shape index: {}]   ;;  %s2123_s3 = inlined_call_operand.hbm [shape: bf16[128,128], index: 3, kind: input, shape index: {}]   ;;  %s2124_s4 = inlined_call_operand.hbm [shape: f32[8,128], index: 4, kind: input, shape index: {}]   ;;  %s2125_s5 = inlined_call_operand.hbm [shape: f32[64,128], index: 5, kind: output, shape index: {}]  }
   0x1   :  { %2135 = sst [smem:[#allocation32_spill]] %s2121_s1 }
   0x2   :  { %2136 = sst [smem:[#allocation33_spill]] %s2122_s2 }
   0x3   :  { %2137 = sst [smem:[#allocation34_spill]] %s2123_s3 }
   0x4   :  { %2138 = sst [smem:[#allocation35_spill]] %s2124_s4 }
   0x5   :  { %2139 = sst [smem:[#allocation36_spill]] %s2125_s5 }
   0x6   :  { %10 = vsyncpa [#allocation13], 0 }
   0x7   :  { %12 = vsyncpa [#allocation13 + $0x1], 0 }
   0x8   :  { %13 = vsyncpa [#allocation16], 0 }
   0x9   :  { %14 = vsyncpa [#allocation19], 0 }
   0xa   :  { %15 = vsyncpa [#allocation14], 0 }
   0xb   :  { %17 = vsyncpa [#allocation14 + $0x1], 0  ;;  %s1816_s18 = smov 0   ;;  %s1818_s19 = smov 0  }
   0xc   :  { %s1820_s20 = smov 0   ;;  %s1822_s21 = smov 0  }
   0xd   :  { %s1824_s22 = smov 0   ;;  %s1826_s23 = smov 0  }
   0xe   :  { %s1828_s24 = smov 0   ;;  %s1830_s25 = smov 0  }
   0xf   :  { %s1832_s26 = smov 0   ;;  %s1834_s27 = smov 0  }
  0x10   :  { %s1836_s28 = smov 0  }
  0x11 LB: > { %2140 = sst [smem:[#allocation26_spill]] %s1731_s18  ;;  %s1152_s29 = sadd.s32 4294967295, %s1771_s28   ;;  %s1771_s28 = sphi %s1836_s28, %s23_s28   ;;  %s1767_s27 = sphi %s1834_s27, %s2166_s27   ;;  %s1763_s26 = sphi %s1832_s26, %s2173_s26   ;;  %s1759_s25 = sphi %s1830_s25, %s2165_s25   ;;  %s1755_s24 = sphi %s1828_s24, %s2164_s24   ;;  %s1751_s23 = sphi %s1826_s23, %s2172_s23   ;;  %s1747_s22 = sphi %s1824_s22, %s2171_s22   ;;  %s1743_s21 = sphi %s1822_s21, %s2170_s21   ;;  %s1739_s20 = sphi %s1820_s20, %s2169_s20   ;;  %s1735_s19 = sphi %s1818_s19, %s2168_s19   ;;  %s1731_s18 = sphi %s1816_s18, %s2167_s18  }
  0x12   : > { %2141 = sst [smem:[#allocation27_spill]] %s1763_s26  ;;  %s1153_s30 = sadd.s32 4294967294, %s1771_s28  }
  0x13   : > { %2142 = sst [smem:[#allocation28_spill]] %s1767_s27  ;;  %p59_p0 = scmp.ne.s32.totalorder %s1747_s22, %s1743_s21 }
  0x14   : > { %p1872_p1 = scmp.eq.s32.totalorder %s1152_s29, 0  ;;  %p170_p2 = scmp.ne.s32.totalorder %s1739_s20, %s1735_s19 }
  0x15   : > { %p171_p3 = scmp.eq.s32.totalorder %s1152_s29, 7  ;;  %p176_p5 = scmp.ne.s32.totalorder %s1735_s19, %s1731_s18 }
  0x16   : > { %p1880_p4 = por %p1872_p1, %p59_p0  ;;  %p177_p7 = scmp.eq.s32.totalorder %s1153_s30, 7 }
  0x17   : > { %p1886_p6 = por %p171_p3, %p170_p2  ;;  %p1154_p8 = scmp.ge.s32.totalorder %s1771_s28, 1 }
  0x18   : > { %p184_p9 = scmp.lt.s32.totalorder %s1771_s28, 9  ;;  %p1892_p10 = por %p177_p7, %p176_p5 }
  0x19   : > { %s2145_s8 = scalar_select %p1886_p6, 1, 0 }
  0x1a   : > { %s2147_s9 = scalar_select %p1892_p10, 1, 0 }
  0x1b   : > { %2146 = sst [smem:[#allocation29_spill]] %s2145_s8  ;;  %p1896_p11 = pnand %p1154_p8, %p184_p9 }
  0x1c   : > { %2148 = sst [smem:[#allocation30_spill]] %s2147_s9  ;;  %s1773_s11 = smov [#allocation15]  }
  0x1d   : > { %s196_s12 = sshll.u32 %s1773_s11, 4  ;;  %p1319_p12 = pneg %p1896_p11  ;;  %s197_s12 = int_to_ptr.vmem [resolvable:$true] %s196_s12 }
  0x1e   : > { %s1774_s14 = smov [#allocation18]   ;;  %s1522_s16 = scalar_lea.vmem %s197_s12, 1024 }
  0x1f   : > { %p1904_p13 = pnand %p1319_p12, %p1872_p1  ;;  %s222_s15 = sshll.u32 %s1774_s14, 4  ;;  %s223_s15 = int_to_ptr.vmem [resolvable:$true] %s222_s15 }
  0x20   : > { %p1523_p2 = scmp.ne.s32.totalorder %s197_s12, %s1522_s16  ;;  %p1530_p7 = scmp.lt.s32.totalorder %s197_s12, %s197_s12 }
  0x21   : > { %p1513_p0 = pneg %p1904_p13  ;;  %p1531_p8 = scmp.lt.s32.totalorder %s1522_s16, %s1522_s16 }
  0x23   : > { %p1525_p3 = pnand %p1523_p2, %p1513_p0  ;;  %p1532_p9 = por %p1531_p8, %p1530_p7 }
  0x25   : > { %p1526_p5 = pneg %p1525_p3 }
  0x27   : > { %p1533_p12 = pnand %p1532_p9, %p1526_p5 }
  0x29   : > { %1536 = shalt.err (!%p1533_p12)
}
  0x2a   : > { %s1775_s17 = smov 64   ;;  %s1776_s21 = smov 4  }
  0x2b   : > { %s2151_s1 = sld [smem:[#allocation32_spill]]  ;;  %s1548_s11 = scalar_lea.vmem %s223_s15, 1024 }
  0x2c   : > { %p1549_p2 = scmp.ne.s32.totalorder %s223_s15, %s1548_s11  ;;  %p1556_p5 = scmp.lt.s32.totalorder %s223_s15, %s223_s15 }
  0x2d   : > { %p1557_p8 = scmp.lt.s32.totalorder %s1548_s11, %s1548_s11 }
  0x2e   : > { %p1551_p3 = pnand %p1549_p2, %p1513_p0 }
  0x2f   : > { %p1558_p9 = por %p1557_p8, %p1556_p5 }
  0x30   : > { %p1552_p7 = pneg %p1551_p3 }
  0x31   : > { %1322 = dma.hbm_to_vmem [thread:$0]  (!%p1904_p13), %s2151_s1, 1024, %s197_s12, [#allocation16], %s1775_s17, %s1775_s17, %s1776_s21  }
  0x32   : > { %p1559_p12 = pnand %p1558_p9, %p1552_p7 }
  0x34   : > { %1562 = shalt.err (!%p1559_p12)
}
  0x35   : > { %s2152_s3 = sld [smem:[#allocation34_spill]]  ;;  %s1777_s12 = smov [#allocation17]  }
  0x36   : > { %s209_s29 = sshll.u32 %s1777_s12, 4  ;;  %s1778_s30 = smov [#allocation20]   ;;  %s210_s29 = int_to_ptr.vmem [resolvable:$true] %s209_s29 }
  0x37   : > { %s236_s1 = sshll.u32 %s1778_s30, 4  ;;  %s1574_s9 = scalar_lea.vmem %s210_s29, 1024  ;;  %s237_s1 = int_to_ptr.vmem [resolvable:$true] %s236_s1 }
  0x38   : > { %p1575_p2 = scmp.ne.s32.totalorder %s210_s29, %s1574_s9  ;;  %p1582_p5 = scmp.lt.s32.totalorder %s210_s29, %s210_s29 }
  0x39   : > { %p1583_p8 = scmp.lt.s32.totalorder %s1574_s9, %s1574_s9 }
  0x3a   : > { %p1577_p3 = pnand %p1575_p2, %p1513_p0 }
  0x3b   : > { %1328 = dma.hbm_to_vmem [thread:$0]  (!%p1904_p13), %s2152_s3, 1024, %s223_s15, [#allocation19], %s1775_s17, %s1775_s17, %s1776_s21  }
  0x3c   : > { %p1578_p7 = pneg %p1577_p3  ;;  %p1584_p9 = por %p1583_p8, %p1582_p5 }
  0x3e   : > { %p1585_p12 = pnand %p1584_p9, %p1578_p7 }
  0x40   : > { %1588 = shalt.err (!%p1585_p12)
}
  0x41   : > { %s2153_s2 = sld [smem:[#allocation33_spill]]  ;;  %s1600_s14 = scalar_lea.vmem %s237_s1, 128 }
  0x42   : > { %p1601_p10 = scmp.ne.s32.totalorder %s237_s1, %s1600_s14  ;;  %p1608_p5 = scmp.lt.s32.totalorder %s237_s1, %s237_s1 }
  0x43   : > { %p1609_p7 = scmp.lt.s32.totalorder %s1600_s14, %s1600_s14 }
  0x44   : > { %p1603_p2 = pnand %p1601_p10, %p1513_p0 }
  0x45   : > { %p1610_p8 = por %p1609_p7, %p1608_p5 }
  0x46   : > { %p1604_p3 = pneg %p1603_p2 }
  0x47   : > { %1325 = dma.hbm_to_vmem [thread:$0]  (!%p1904_p13), %s2153_s2, 1024, %s210_s29, [#allocation16], %s1775_s17, %s1775_s17, %s1776_s21  }
  0x48   : > { %p1611_p9 = pnand %p1610_p8, %p1604_p3 }
  0x4a   : > { %1614 = shalt.err (!%p1611_p9)
}
  0x4b   : > { %s2154_s4 = sld [smem:[#allocation35_spill]]  ;;  %s32_s17 = sadd.s32 1, %s1763_s26 }
  0x4c   : > { %p33_p10 = scmp.ge.s32.totalorder %s32_s17, 2  ;;  %s35_s21 = sadd.s32 1, %s1767_s27 }
  0x4d   : > { %p39_p0 = scmp.eq.s32.totalorder %s1767_s27, 0  ;;  %s46_s13 = sadd.s32 1, %s1751_s23 }
  0x4e   : > { %s2175_s17 = smov (%p33_p10, %s32_s17), 0  ;;  %s2177_s21 = smov (!%p33_p10, %s35_s21), %s1767_s27 }
  0x4f   : > { %s40_s12 = scalar_select %p39_p0, %s1763_s26, 1 }
  0x50   : > { %p37_p12 = scmp.ge.s32.totalorder %s2177_s21, 4  ;;  %p53_p2 = scmp.ne.s32.totalorder %s1751_s23, %s1747_s22 }
  0x51   : > { %1331 = dma.hbm_to_vmem [thread:$0]  (!%p1904_p13), %s2154_s4, 128, %s237_s1, [#allocation19]  }
  0x52   : > { %p54_p3 = scmp.eq.s32.totalorder %s1771_s28, 0  ;;  %p153_p5 = scmp.eq.s32.totalorder %s1767_s27, 3 }
  0x53   : > { %s2179_s21 = smov (%p37_p12, %s2177_s21), 0  ;;  %s160_s29 = sadd.s32 1, %s1739_s20 }
  0x54   : > { %2155 = sst [smem:[#allocation31_spill]] %s2179_s21  ;;  %p1965_p13 = por %p54_p3, %p53_p2 }
  0x55   : > { %p41_p7 = scmp.eq.s32.totalorder %s2179_s21, 0  ;;  %p155_p8 = scmp.eq.s32.totalorder %s2179_s21, 3 }
  0x56   : > { %s154_s30 = scalar_select %p153_p5, %s1763_s26, 0 }
  0x57   : > { %s42_s15 = scalar_select %p41_p7, %s2175_s17, 1 }
  0x58   : > { %s156_s11 = scalar_select %p155_p8, %s2175_s17, 0 }
  0x59   : > { %s43_s14 = ssub.s32 %s40_s12, %s42_s15  ;;  %p1344_p9 = scmp.lt.s32.totalorder %s1771_s28, 8 }
  0x5a   : > { %p44_p10 = scmp.eq.s32.totalorder %s43_s14, 0  ;;  %s157_s9 = ssub.s32 %s154_s30, %s156_s11 }
  0x5b   : > { %p158_p0 = scmp.eq.s32.totalorder %s157_s9, 0  ;;  %s247_s16 = sand.u32 1, %s1751_s23  }
  0x5c   : > { %s1978_s2 = scalar_select %p44_p10, %s1751_s23, %s46_s13  }
  0x5d   : > { %s1981_s3 = scalar_select %p158_p0, %s1739_s20, %s160_s29  }
  0x5e   : > { %s1160_s4 = sshll.u32 %s247_s16, 5  ;;  %s1207_s27 = sshll.u32 %s40_s12, 9 }
  0x5f   : > { %s259_s21 = scalar_lea.hbm %s2120_s0, %s1207_s27  ;;  %s251_s26 = scalar_lea.vmem [#allocation12], %s1160_s4 }
  0x60   : > { %s260_s8 = sshll.u32 %s251_s26, 4  ;;  %p1990_p12 = pnand %p1344_p9, %p1965_p13  ;;  %s261_s8 = int_to_ptr.vmem [resolvable:$true] %s260_s8 }
  0x61   : > { %s248_s13 = scalar_lea.sflag [#allocation13], %s247_s16  ;;  %s1628_s29 = scalar_lea.vmem %s261_s8, 512 }
  0x62   : > { %p1617_p2 = pneg %p1990_p12  ;;  %p1629_p3 = scmp.ne.s32.totalorder %s261_s8, %s1628_s29 }
  0x63   : > { %s1779_s12 = smov [#allocation12]  }
  0x64   : > { %p1631_p5 = pnand %p1629_p3, %p1617_p2  ;;  %s1633_s5 = sshll.u32 %s1779_s12, 4  ;;  %s1634_s5 = int_to_ptr.vmem [resolvable:$false] %s1633_s5 }
  0x65   : > { %s1635_s4 = scalar_lea.vmem %s1634_s5, 1024  ;;  %p1636_p8 = scmp.lt.s32.totalorder %s261_s8, %s1634_s5 }
  0x66   : > { %p1632_p7 = pneg %p1631_p5  ;;  %p1637_p10 = scmp.lt.s32.totalorder %s1635_s4, %s1628_s29 }
  0x68   : > { %p1638_p0 = por %p1637_p10, %p1636_p8 }
  0x6a   : > { %p1639_p6 = pnand %p1638_p0, %p1632_p7 }
  0x6c   : > { %1642 = shalt.err (!%p1639_p6)
}
  0x6d   : > { %s1780_s18 = smov 128   ;;  %s1781_s26 = smov 8  }
  0x6e   : > { %1335 = dma.hbm_to_vmem [thread:$0]  (!%p1990_p12), %s259_s21, 512, %s261_s8, %s248_s13, %s1780_s18, %s1780_s18, %s1781_s26  }
  0x6f   : > { %272 = sbr.rel (%p1896_p11) target bundleno = 1056 (0x420), region = 40  ;;  %s274_s27 = sand.u32 (!%p1896_p11), 1, %s1747_s22  }
  0x70   : > { %s1164_s1 = sshll.u32 (!%p1896_p11), %s274_s27, 5  ;;  %s275_s30 = scalar_lea.sflag (!%p1896_p11), [#allocation13], %s274_s27 }
  0x71   : > { %s2001_s11 = scalar_lea.vmem (!%p1896_p11), [#allocation12], %s1164_s1 }
  0x74   : > { %1714 = dma.done.wait (%p1880_p4), %s275_s30, 512  }
  0x75   : > { %1716 = vsyncadd (%p1880_p4), %s275_s30, 4294966784 }
  0x76   : > { %1718 = dma.done.wait (%p1872_p1), [#allocation16], 2048  }
  0x77   : > { %1720 = vsyncadd (%p1872_p1), [#allocation16], 4294965248 }
  0x78   : > { %1722 = dma.done.wait (%p1872_p1), [#allocation19], 1152  }
  0x79   : > { %1724 = vsyncadd (%p1872_p1), [#allocation19], 4294966144  ;;  %s318_s8 = sand.u32 1, %s1735_s19   ;;  %p328_p6 = scmp.eq.s32.totalorder %s1759_s25, 0 }
  0x7a   : > { %s1169_s7 = sshll.u32 %s318_s8, 5  ;;  %p329_p4 = scmp.eq.s32.totalorder %s1755_s24, 0 }
  0x7b   : > { %s2020_s10 = scalar_lea.vmem [#allocation21], %s1169_s7 }
  0x7c   : > { %p330_p11 = pnand %p329_p4, %p328_p6 }
  0x7e   : > { %333 = sbr.rel (%p330_p11) target bundleno = 135 (0x87), region = 64 }
  0x83   : > { %v1782_v0 = vmov 0.0  }
  0x84   : > { %334 = vst [vmem:[#allocation2] sm:$0x1] %v1782_v0  ;;  %335 = vst [vmem:[#allocation3] sm:$0x1] %v1782_v0 }
  0x85   : > { %336 = vst [vmem:[#allocation4] sm:$0x1] %v1782_v0  ;;  %337 = vst [vmem:[#allocation5] sm:$0x1] %v1782_v0 }
  0x86   : > { %338 = vst [vmem:[#allocation6] sm:$0x1] %v1782_v0  ;;  %339 = vst [vmem:[#allocation7] sm:$0x1] %v1782_v0 }
  0x87 PF: > { %p1170_p1 = scmp.ne.s32.totalorder %s1759_s25, 0 }
  0x88   : > { %s1179_s6 = sshll.u32 (!%p1170_p1), %s1755_s24, 5 }
  0x89   : > { %342 = sbr.rel (%p1170_p1) target bundleno = 397 (0x18d), region = 68  ;;  %s472_s21 = scalar_lea.vmem (!%p1170_p1), [#allocation11], %s1179_s6 }
  0x8a   : > { %s463_s14 = scalar_lea.vmem (!%p1170_p1), [#allocation8], %s1179_s6 }
  0x8e   : > { %v1449_v1 = vld [vmem:[#allocation15 + $0x38] sm:$0xff]   ;;  %v1450_v2 = vld [vmem:[#allocation15 + $0x30] sm:$0xff]   ;;  %v1451_v3 = vld [vmem:[#allocation15 + $0x28] sm:$0xff]  }
  0x8f   : > { %1239 = vmatprep.subr.bf16.mxu0 %v1449_v1  ;;  %v1452_v4 = vld [vmem:[#allocation15 + $0x20] sm:$0xff]   ;;  %v344_v6 = vld [vmem:[%s2001_s11 + $0x8] sm:$0xff]  ;;  %v1453_v8 = vld [vmem:[#allocation15 + $0x18] sm:$0xff]  }
  0x90   : > { %1240 = vmatpush3.bf16.msra.mxu0 %v1449_v1  ;;  %v343_v5 = vld [vmem:[%s2001_s11] sm:$0xff]  ;;  %v1454_v9 = vld [vmem:[#allocation15 + $0x10] sm:$0xff]   ;;  %v1455_v10 = vld [vmem:[#allocation15 + $0x8] sm:$0xff]  }
  0x91   : > { %1241 = vmatprep.subr.bf16.mxu0 %v1450_v2  ;;  %v347_v7 = vpack.c.bf16 %v344_v6, %v343_v5  ;;  %v1456_v11 = vld [vmem:[#allocation15] sm:$0xff]   ;;  %v345_v12 = vld [vmem:[%s2001_s11 + $0x10] sm:$0xff]  ;;  %v346_v13 = vld [vmem:[%s2001_s11 + $0x18] sm:$0xff]  ;;  %1457 = vtanh.f32 %v343_v5 }
  0x92   : > { %v348_v14 = vpack.c.bf16 %v346_v13, %v345_v12  ;;  %1459 = vtanh.f32 %v344_v6  ;;  %v477_v42 = vld [vmem:[#allocation2] sm:$0x1]  ;;  %v489_v45 = vld [vmem:[#allocation3] sm:$0x1] }
  0x93   : > { %1255 = vmatprep.mubr.bf16.mxu0 %v347_v7  ;;  %1461 = vtanh.f32 %v345_v12 }
  0x94   : > { %1242 = vmatpush3.bf16.msra.mxu0 %v1450_v2  ;;  %1463 = vtanh.f32 %v346_v13 }
  0x95   : > { %1243 = vmatprep.subr.bf16.mxu0 %v1451_v3 }
  0x98   : > { %1244 = vmatpush3.bf16.msra.mxu0 %v1451_v3 }
  0x99   : > { %1245 = vmatprep.subr.bf16.mxu0 %v1452_v4 }
  0x9c   : > { %1246 = vmatpush3.bf16.msra.mxu0 %v1452_v4 }
  0x9d   : > { %1247 = vmatprep.subr.bf16.mxu0 %v1453_v8 }
  0x9e   : > { %v1458_v15 = vpop.eup %1457 }
  0x9f   : > { %v1460_v16 = vpop.eup %1459  ;;  %473 = vst [vmem:[%s472_s21] sm:$0xff] %v1458_v15 }
  0xa0   : > { %1248 = vmatpush3.bf16.msra.mxu0 %v1453_v8  ;;  %v1462_v17 = vpop.eup %1461  ;;  %474 = vst [vmem:[%s472_s21 + $0x8] sm:$0xff] %v1460_v16 }
  0xa1   : > { %1249 = vmatprep.subr.bf16.mxu0 %v1454_v9  ;;  %v1464_v18 = vpop.eup %1463  ;;  %475 = vst [vmem:[%s472_s21 + $0x10] sm:$0xff] %v1462_v17 }
  0xa2   : > { %476 = vst [vmem:[%s472_s21 + $0x18] sm:$0xff] %v1464_v18 }
  0xa4   : > { %1250 = vmatpush3.bf16.msra.mxu0 %v1454_v9 }
  0xa5   : > { %1251 = vmatprep.subr.bf16.mxu0 %v1455_v10 }
  0xa8   : > { %1252 = vmatpush3.bf16.msra.mxu0 %v1455_v10 }
  0xa9   : > { %1253 = vmatprep.subr.bf16.mxu0 %v1456_v11 }
  0xac   : > { %1254 = vmatpush3.bf16.msra.mxu0 %v1456_v11 }
  0xaf   : > { %1256 = vmatmul.mubr.bf16.vlgmr.msra.gmra.mxu0 %v348_v14 }
 0x16f   : > { %v1257_v19 = vpop.f32.mrf.mxu0 }
 0x170   : > { %466 = vst [vmem:[%s463_s14 + $0x10] sm:$0xff] %v1257_v19  ;;  %v492_v26 = vmul.f32 %v1257_v19, %v1257_v19 }
 0x171   : > { %v447_v20 = vpop.f32.mrf.mxu0 }
 0x172   : > { %464 = vst [vmem:[%s463_s14] sm:$0xff] %v447_v20  ;;  %v490_v23 = vmul.f32 %v447_v20, %v447_v20 }
 0x173   : > { %v1258_v21 = vpop.f32.mrf.mxu0 }
 0x174   : > { %467 = vst [vmem:[%s463_s14 + $0x18] sm:$0xff] %v1258_v21  ;;  %v493_v29 = vmul.f32 %v1258_v21, %v1258_v21 }
 0x175   : > { %v450_v22 = vpop.f32.mrf.mxu0 }
 0x176   : > { %465 = vst [vmem:[%s463_s14 + $0x8] sm:$0xff] %v450_v22  ;;  %v478_v24 = vadd.f32 %v450_v22, %v447_v20  ;;  %v491_v25 = vmul.f32 %v450_v22, %v450_v22 }
 0x178   : > { %v479_v27 = vadd.f32 %v1257_v19, %v478_v24  ;;  %v494_v28 = vadd.f32 %v491_v25, %v490_v23 }
 0x17a   : > { %v480_v30 = vadd.f32 %v1258_v21, %v479_v27  ;;  %v495_v31 = vadd.f32 %v494_v28, %v492_v26 }
 0x17c   : > { %v481_v32 = vrot.slane %v480_v30, 4  ;;  %v496_v33 = vadd.f32 %v495_v31, %v493_v29 }
 0x17e   : > { %v482_v34 = vadd.f32 %v481_v32, %v480_v30  ;;  %v497_v35 = vrot.slane %v496_v33, 4 }
 0x180   : > { %v483_v36 = vrot.slane %v482_v34, 2  ;;  %v498_v37 = vadd.f32 %v497_v35, %v496_v33 }
 0x182   : > { %v484_v38 = vadd.f32 %v483_v36, %v482_v34  ;;  %v499_v39 = vrot.slane %v498_v37, 2 }
 0x184   : > { %v485_v40 = vrot.slane %v484_v38, 1  ;;  %v500_v41 = vadd.f32 %v499_v39, %v498_v37 }
 0x186   : > { %v486_v43 = vadd.f32 %v485_v40, %v484_v38  ;;  %v501_v44 = vrot.slane %v500_v41, 1 }
 0x188   : > { %v487_v46 = vadd.f32 %v486_v43, %v477_v42  ;;  %v502_v47 = vadd.f32 %v501_v44, %v500_v41 }
 0x18a   : > { %488 = vst [vmem:[#allocation2] sm:$0x1] %v487_v46  ;;  %v503_v48 = vadd.f32 %v502_v47, %v489_v45 }
 0x18c   : > { %504 = vst [vmem:[#allocation3] sm:$0x1] %v503_v48 }
 0x18d PF: > { %p1180_p13 = scmp.ne.s32.totalorder %s1759_s25, 1 }
 0x18e   : > { %s2030_s9 = sshll.u32 (!%p1180_p13), %s1755_s24, 5 }
 0x18f   : > { %508 = sbr.rel (%p1180_p13) target bundleno = 682 (0x2aa), region = 72  ;;  %s524_s16 = scalar_lea.vmem (!%p1180_p13), [#allocation8], %s2030_s9 }
 0x190   : > { %s664_s15 = scalar_lea.vmem (!%p1180_p13), [#allocation9], %s2030_s9 }
 0x194   : > { %v1465_v49 = vld [vmem:[#allocation17 + $0x38] sm:$0xff]   ;;  %v1466_v50 = vld [vmem:[#allocation17 + $0x30] sm:$0xff]   ;;  %v1467_v51 = vld [vmem:[#allocation17 + $0x28] sm:$0xff]   ;;  %v529_v0 = vlaneseq  ;;  %v674_v32 = vstv %s2030_s9 }
 0x195   : > { %1259 = vmatprep.subr.bf16.mxu0 %v1465_v49  ;;  %v1468_v52 = vld [vmem:[#allocation17 + $0x20] sm:$0xff]   ;;  %v511_v53 = vld [vmem:[#allocation2] sm:$0x1]  ;;  %v513_v55 = vld [vmem:[#allocation3] sm:$0x1] }
 0x196   : > { %1260 = vmatpush3.bf16.msra.mxu0 %v1465_v49  ;;  %v512_v54 = vmul.f32 0.020833334, %v511_v53  ;;  %v514_v56 = vmul.f32 0.020833334, %v513_v55  ;;  %v1469_v58 = vld [vmem:[#allocation17 + $0x18] sm:$0xff]   ;;  %v1470_v61 = vld [vmem:[#allocation17 + $0x10] sm:$0xff]  }
 0x197   : > { %1261 = vmatprep.subr.bf16.mxu0 %v1466_v50  ;;  %v1471_v63 = vld [vmem:[#allocation17 + $0x8] sm:$0xff]   ;;  %v1472_v1 = vld [vmem:[#allocation17] sm:$0xff]   ;;  %v530_v2 = vshrl.u32 %v529_v0, 7  ;;  %v528_v13 = vld [vmem:[%s524_s16 + $0x18] sm:$0xff] }
 0x198   : > { %v515_v57 = vmul.f32 %v512_v54, %v512_v54  ;;  %v509_v3 = vld [vmem:[#allocation20] sm:$0x1]  ;;  %v510_v6 = vld [vmem:[#allocation20 + $0x1] sm:$0x1]  ;;  %v526_v9 = vld [vmem:[%s524_s16 + $0x8] sm:$0xff] }
 0x199   : > { %v531_v4 = vsub.s32 0, %v530_v2  ;;  %v525_v8 = vld [vmem:[%s524_s16] sm:$0xff]  ;;  %v527_v10 = vld [vmem:[%s524_s16 + $0x10] sm:$0xff]  ;;  %v672_v30 = vadd.s32 16, %v530_v2  ;;  %v671_v31 = vadd.s32 8, %v530_v2  ;;  %v675_v33 = vadd.s32 %v674_v32, %v530_v2 }
 0x19a   : > { %1262 = vmatpush3.bf16.msra.mxu0 %v1466_v50  ;;  %v516_v59 = vsub.f32 %v514_v56, %v515_v57  ;;  %v673_v34 = vadd.s32 24, %v530_v2 }
 0x19b   : > { %1263 = vmatprep.subr.bf16.mxu0 %v1467_v51  ;;  %v677_v36 = vadd.s32 %v674_v32, %v672_v30  ;;  %v676_v37 = vadd.s32 %v674_v32, %v671_v31  ;;  %vm679_vm0 = vcmp.lt.s32.totalorder %v675_v33, 48 }
 0x19c   : > { %v517_v60 = vmax.f32 %v516_v59, 0.0  ;;  %v678_v39 = vadd.s32 %v674_v32, %v673_v34 }
 0x19d   : > { %vm681_vm1 = vcmp.lt.s32.totalorder %v677_v36, 48  ;;  %vm680_vm2 = vcmp.lt.s32.totalorder %v676_v37, 48 }
 0x19e   : > { %1264 = vmatpush3.bf16.msra.mxu0 %v1467_v51  ;;  %v518_v62 = vadd.f32 0.0001, %v517_v60  ;;  %vm682_vm3 = vcmp.lt.s32.totalorder %v678_v39, 48 }
 0x19f   : > { %1265 = vmatprep.subr.bf16.mxu0 %v1468_v52 }
 0x1a0   : > { %1473 = vrsqrt.f32 %v518_v62 }
 0x1a2   : > { %1266 = vmatpush3.bf16.msra.mxu0 %v1468_v52 }
 0x1a3   : > { %1267 = vmatprep.subr.bf16.mxu0 %v1469_v58 }
 0x1a6   : > { %1268 = vmatpush3.bf16.msra.mxu0 %v1469_v58 }
 0x1a7   : > { %1269 = vmatprep.subr.bf16.mxu0 %v1470_v61 }
 0x1aa   : > { %1270 = vmatpush3.bf16.msra.mxu0 %v1470_v61 }
 0x1ab   : > { %1271 = vmatprep.subr.bf16.mxu0 %v1471_v63 }
 0x1ad   : > { %v1474_v5 = vpop.eup %1473 }
 0x1ae   : > { %1272 = vmatpush3.bf16.msra.mxu0 %v1471_v63  ;;  %v520_v7 = vmul.f32 %v1474_v5, %v509_v3 }
 0x1af   : > { %1273 = vmatprep.subr.bf16.mxu0 %v1472_v1 }
 0x1b0   : > { %v521_v11 = vmul.f32 %v520_v7, %v512_v54  ;;  %v532_v12 = vrot.slane %v520_v7, %v531_v4 }
 0x1b2   : > { %1274 = vmatpush3.bf16.msra.mxu0 %v1472_v1  ;;  %v522_v14 = vsub.f32 %v510_v6, %v521_v11  ;;  %v533_v15 = vmul.f32 %v532_v12, %v525_v8  ;;  %v534_v16 = vmul.f32 %v532_v12, %v526_v9  ;;  %v535_v17 = vmul.f32 %v532_v12, %v527_v10  ;;  %v695_v1 = vld [vmem:[#allocation4] sm:$0x1] }
 0x1b3   : > { %v536_v18 = vmul.f32 %v532_v12, %v528_v13 }
 0x1b4   : > { %v540_v19 = vrot.slane %v522_v14, %v531_v4  ;;  %v707_v4 = vld [vmem:[#allocation5] sm:$0x1] }
 0x1b6   : > { %v541_v20 = vadd.f32 %v540_v19, %v533_v15  ;;  %v542_v21 = vadd.f32 %v540_v19, %v534_v16  ;;  %v543_v22 = vadd.f32 %v540_v19, %v535_v17  ;;  %v544_v23 = vadd.f32 %v540_v19, %v536_v18 }
 0x1b8   : > { %1475 = vtanh.f32 %v541_v20 }
 0x1b9   : > { %1477 = vtanh.f32 %v542_v21 }
 0x1ba   : > { %1479 = vtanh.f32 %v543_v22 }
 0x1bb   : > { %1481 = vtanh.f32 %v544_v23 }
 0x1c5   : > { %v1476_v24 = vpop.eup %1475 }
 0x1c6   : > { %v1478_v25 = vpop.eup %1477 }
 0x1c7   : > { %v1480_v26 = vpop.eup %1479  ;;  %v549_v27 = vpack.c.bf16 %v1478_v25, %v1476_v24 }
 0x1c8   : > { %v1482_v28 = vpop.eup %1481 }
 0x1c9   : > { %1275 = vmatprep.mubr.bf16.mxu0 %v549_v27  ;;  %v550_v29 = vpack.c.bf16 %v1482_v28, %v1480_v26 }
 0x1cb   : > { %1276 = vmatmul.mubr.bf16.vlgmr.msra.gmra.mxu0 %v550_v29 }
 0x28b   : > { %v1277_v35 = vpop.f32.mrf.mxu0 }
 0x28c   : > { %667 = vst [vmem:[%s664_s15 + $0x10] sm:$0xff] %v1277_v35  ;;  %v693_v43 = vsel %vm681_vm1, %v1277_v35, 0.0 }
 0x28d   : > { %v649_v38 = vpop.f32.mrf.mxu0  ;;  %v710_v49 = vmul.f32 %v693_v43, %v693_v43 }
 0x28e   : > { %665 = vst [vmem:[%s664_s15] sm:$0xff] %v649_v38  ;;  %v691_v41 = vsel %vm679_vm0, %v649_v38, 0.0 }
 0x28f   : > { %v1278_v40 = vpop.f32.mrf.mxu0  ;;  %v708_v45 = vmul.f32 %v691_v41, %v691_v41 }
 0x290   : > { %668 = vst [vmem:[%s664_s15 + $0x18] sm:$0xff] %v1278_v40  ;;  %v694_v48 = vsel %vm682_vm3, %v1278_v40, 0.0 }
 0x291   : > { %v652_v42 = vpop.f32.mrf.mxu0  ;;  %v711_v52 = vmul.f32 %v694_v48, %v694_v48 }
 0x292   : > { %666 = vst [vmem:[%s664_s15 + $0x8] sm:$0xff] %v652_v42  ;;  %v692_v44 = vsel %vm680_vm2, %v652_v42, 0.0 }
 0x293   : > { %v696_v46 = vadd.f32 %v692_v44, %v691_v41  ;;  %v709_v47 = vmul.f32 %v692_v44, %v692_v44 }
 0x295   : > { %v697_v50 = vadd.f32 %v696_v46, %v693_v43  ;;  %v712_v51 = vadd.f32 %v709_v47, %v708_v45 }
 0x297   : > { %v698_v53 = vadd.f32 %v697_v50, %v694_v48  ;;  %v713_v54 = vadd.f32 %v712_v51, %v710_v49 }
 0x299   : > { %v699_v55 = vrot.slane %v698_v53, 4  ;;  %v714_v56 = vadd.f32 %v713_v54, %v711_v52 }
 0x29b   : > { %v700_v57 = vadd.f32 %v699_v55, %v698_v53  ;;  %v715_v58 = vrot.slane %v714_v56, 4 }
 0x29d   : > { %v701_v59 = vrot.slane %v700_v57, 2  ;;  %v716_v60 = vadd.f32 %v715_v58, %v714_v56 }
 0x29f   : > { %v702_v61 = vadd.f32 %v701_v59, %v700_v57  ;;  %v717_v62 = vrot.slane %v716_v60, 2 }
 0x2a1   : > { %v703_v63 = vrot.slane %v702_v61, 1  ;;  %v718_v0 = vadd.f32 %v717_v62, %v716_v60 }
 0x2a3   : > { %v704_v2 = vadd.f32 %v703_v63, %v702_v61  ;;  %v719_v3 = vrot.slane %v718_v0, 1 }
 0x2a5   : > { %v705_v5 = vadd.f32 %v704_v2, %v695_v1  ;;  %v720_v6 = vadd.f32 %v719_v3, %v718_v0 }
 0x2a7   : > { %706 = vst [vmem:[#allocation4] sm:$0x1] %v705_v5  ;;  %v721_v7 = vadd.f32 %v720_v6, %v707_v4 }
 0x2a9   : > { %722 = vst [vmem:[#allocation5] sm:$0x1] %v721_v7 }
 0x2aa PF: > { %p1190_p9 = scmp.ne.s32.totalorder %s1759_s25, 2 }
 0x2ab   : > { %s2037_s13 = sshll.u32 (!%p1190_p9), %s1755_s24, 5 }
 0x2ac   : > { %726 = sbr.rel (%p1190_p9) target bundleno = 967 (0x3c7), region = 76  ;;  %s742_s29 = scalar_lea.vmem (!%p1190_p9), [#allocation9], %s2037_s13 }
 0x2ad   : > { %s882_s12 = scalar_lea.vmem (!%p1190_p9), [#allocation10], %s2037_s13 }
 0x2b1   : > { %v1483_v8 = vld [vmem:[#allocation18 + $0x38] sm:$0xff]   ;;  %v1484_v9 = vld [vmem:[#allocation18 + $0x30] sm:$0xff]   ;;  %v1485_v10 = vld [vmem:[#allocation18 + $0x28] sm:$0xff]   ;;  %v747_v23 = vlaneseq  ;;  %v892_v55 = vstv %s2037_s13 }
 0x2b2   : > { %1279 = vmatprep.subr.bf16.mxu0 %v1483_v8  ;;  %v1486_v11 = vld [vmem:[#allocation18 + $0x20] sm:$0xff]   ;;  %v729_v12 = vld [vmem:[#allocation4] sm:$0x1]  ;;  %v731_v14 = vld [vmem:[#allocation5] sm:$0x1] }
 0x2b3   : > { %1280 = vmatpush3.bf16.msra.mxu0 %v1483_v8  ;;  %v730_v13 = vmul.f32 0.020833334, %v729_v12  ;;  %v732_v15 = vmul.f32 0.020833334, %v731_v14  ;;  %v1487_v17 = vld [vmem:[#allocation18 + $0x18] sm:$0xff]   ;;  %v1488_v20 = vld [vmem:[#allocation18 + $0x10] sm:$0xff]  }
 0x2b4   : > { %1281 = vmatprep.subr.bf16.mxu0 %v1484_v9  ;;  %v1489_v22 = vld [vmem:[#allocation18 + $0x8] sm:$0xff]   ;;  %v1490_v24 = vld [vmem:[#allocation18] sm:$0xff]   ;;  %v748_v25 = vshrl.u32 %v747_v23, 7  ;;  %v746_v36 = vld [vmem:[%s742_s29 + $0x18] sm:$0xff] }
 0x2b5   : > { %v733_v16 = vmul.f32 %v730_v13, %v730_v13  ;;  %v727_v26 = vld [vmem:[#allocation20 + $0x2] sm:$0x1]  ;;  %v728_v29 = vld [vmem:[#allocation20 + $0x3] sm:$0x1]  ;;  %v743_v31 = vld [vmem:[%s742_s29] sm:$0xff] }
 0x2b6   : > { %v749_v27 = vsub.s32 0, %v748_v25  ;;  %v744_v32 = vld [vmem:[%s742_s29 + $0x8] sm:$0xff]  ;;  %v745_v33 = vld [vmem:[%s742_s29 + $0x10] sm:$0xff]  ;;  %v890_v53 = vadd.s32 16, %v748_v25  ;;  %v889_v54 = vadd.s32 8, %v748_v25  ;;  %v893_v56 = vadd.s32 %v892_v55, %v748_v25 }
 0x2b7   : > { %1282 = vmatpush3.bf16.msra.mxu0 %v1484_v9  ;;  %v734_v18 = vsub.f32 %v732_v15, %v733_v16  ;;  %v891_v57 = vadd.s32 24, %v748_v25 }
 0x2b8   : > { %1283 = vmatprep.subr.bf16.mxu0 %v1485_v10  ;;  %v895_v59 = vadd.s32 %v892_v55, %v890_v53  ;;  %v894_v60 = vadd.s32 %v892_v55, %v889_v54  ;;  %vm897_vm4 = vcmp.lt.s32.totalorder %v893_v56, 48 }
 0x2b9   : > { %v735_v19 = vmax.f32 %v734_v18, 0.0  ;;  %v896_v62 = vadd.s32 %v892_v55, %v891_v57 }
 0x2ba   : > { %vm899_vm5 = vcmp.lt.s32.totalorder %v895_v59, 48  ;;  %vm898_vm6 = vcmp.lt.s32.totalorder %v894_v60, 48 }
 0x2bb   : > { %1284 = vmatpush3.bf16.msra.mxu0 %v1485_v10  ;;  %v736_v21 = vadd.f32 0.0001, %v735_v19  ;;  %vm900_vm7 = vcmp.lt.s32.totalorder %v896_v62, 48 }
 0x2bc   : > { %1285 = vmatprep.subr.bf16.mxu0 %v1486_v11 }
 0x2bd   : > { %1491 = vrsqrt.f32 %v736_v21 }
 0x2bf   : > { %1286 = vmatpush3.bf16.msra.mxu0 %v1486_v11 }
 0x2c0   : > { %1287 = vmatprep.subr.bf16.mxu0 %v1487_v17 }
 0x2c3   : > { %1288 = vmatpush3.bf16.msra.mxu0 %v1487_v17 }
 0x2c4   : > { %1289 = vmatprep.subr.bf16.mxu0 %v1488_v20 }
 0x2c7   : > { %1290 = vmatpush3.bf16.msra.mxu0 %v1488_v20 }
 0x2c8   : > { %1291 = vmatprep.subr.bf16.mxu0 %v1489_v22 }
 0x2ca   : > { %v1492_v28 = vpop.eup %1491 }
 0x2cb   : > { %1292 = vmatpush3.bf16.msra.mxu0 %v1489_v22  ;;  %v738_v30 = vmul.f32 %v1492_v28, %v727_v26 }
 0x2cc   : > { %1293 = vmatprep.subr.bf16.mxu0 %v1490_v24 }
 0x2cd   : > { %v739_v34 = vmul.f32 %v738_v30, %v730_v13  ;;  %v750_v35 = vrot.slane %v738_v30, %v749_v27 }
 0x2cf   : > { %1294 = vmatpush3.bf16.msra.mxu0 %v1490_v24  ;;  %v740_v37 = vsub.f32 %v728_v29, %v739_v34  ;;  %v751_v38 = vmul.f32 %v750_v35, %v743_v31  ;;  %v752_v39 = vmul.f32 %v750_v35, %v744_v32  ;;  %v753_v40 = vmul.f32 %v750_v35, %v745_v33  ;;  %v913_v24 = vld [vmem:[#allocation6] sm:$0x1] }
 0x2d0   : > { %v754_v41 = vmul.f32 %v750_v35, %v746_v36 }
 0x2d1   : > { %v758_v42 = vrot.slane %v740_v37, %v749_v27  ;;  %v925_v27 = vld [vmem:[#allocation7] sm:$0x1] }
 0x2d3   : > { %v759_v43 = vadd.f32 %v758_v42, %v751_v38  ;;  %v760_v44 = vadd.f32 %v758_v42, %v752_v39  ;;  %v761_v45 = vadd.f32 %v758_v42, %v753_v40  ;;  %v762_v46 = vadd.f32 %v758_v42, %v754_v41 }
 0x2d5   : > { %1493 = vtanh.f32 %v759_v43 }
 0x2d6   : > { %1495 = vtanh.f32 %v760_v44 }
 0x2d7   : > { %1497 = vtanh.f32 %v761_v45 }
 0x2d8   : > { %1499 = vtanh.f32 %v762_v46 }
 0x2e2   : > { %v1494_v47 = vpop.eup %1493 }
 0x2e3   : > { %v1496_v48 = vpop.eup %1495 }
 0x2e4   : > { %v1498_v49 = vpop.eup %1497  ;;  %v767_v50 = vpack.c.bf16 %v1496_v48, %v1494_v47 }
 0x2e5   : > { %v1500_v51 = vpop.eup %1499 }
 0x2e6   : > { %1295 = vmatprep.mubr.bf16.mxu0 %v767_v50  ;;  %v768_v52 = vpack.c.bf16 %v1500_v51, %v1498_v49 }
 0x2e8   : > { %1296 = vmatmul.mubr.bf16.vlgmr.msra.gmra.mxu0 %v768_v52 }
 0x3a8   : > { %v1297_v58 = vpop.f32.mrf.mxu0 }
 0x3a9   : > { %885 = vst [vmem:[%s882_s12 + $0x10] sm:$0xff] %v1297_v58  ;;  %v911_v2 = vsel %vm899_vm5, %v1297_v58, 0.0 }
 0x3aa   : > { %v867_v61 = vpop.f32.mrf.mxu0  ;;  %v928_v8 = vmul.f32 %v911_v2, %v911_v2 }
 0x3ab   : > { %883 = vst [vmem:[%s882_s12] sm:$0xff] %v867_v61  ;;  %v909_v0 = vsel %vm897_vm4, %v867_v61, 0.0 }
 0x3ac   : > { %v1298_v63 = vpop.f32.mrf.mxu0  ;;  %v926_v4 = vmul.f32 %v909_v0, %v909_v0 }
 0x3ad   : > { %886 = vst [vmem:[%s882_s12 + $0x18] sm:$0xff] %v1298_v63  ;;  %v912_v7 = vsel %vm900_vm7, %v1298_v63, 0.0 }
 0x3ae   : > { %v870_v1 = vpop.f32.mrf.mxu0  ;;  %v929_v11 = vmul.f32 %v912_v7, %v912_v7 }
 0x3af   : > { %884 = vst [vmem:[%s882_s12 + $0x8] sm:$0xff] %v870_v1  ;;  %v910_v3 = vsel %vm898_vm6, %v870_v1, 0.0 }
 0x3b0   : > { %v914_v5 = vadd.f32 %v910_v3, %v909_v0  ;;  %v927_v6 = vmul.f32 %v910_v3, %v910_v3 }
 0x3b2   : > { %v915_v9 = vadd.f32 %v914_v5, %v911_v2  ;;  %v930_v10 = vadd.f32 %v927_v6, %v926_v4 }
 0x3b4   : > { %v916_v12 = vadd.f32 %v915_v9, %v912_v7  ;;  %v931_v13 = vadd.f32 %v930_v10, %v928_v8 }
 0x3b6   : > { %v917_v14 = vrot.slane %v916_v12, 4  ;;  %v932_v15 = vadd.f32 %v931_v13, %v929_v11 }
 0x3b8   : > { %v918_v16 = vadd.f32 %v917_v14, %v916_v12  ;;  %v933_v17 = vrot.slane %v932_v15, 4 }
 0x3ba   : > { %v919_v18 = vrot.slane %v918_v16, 2  ;;  %v934_v19 = vadd.f32 %v933_v17, %v932_v15 }
 0x3bc   : > { %v920_v20 = vadd.f32 %v919_v18, %v918_v16  ;;  %v935_v21 = vrot.slane %v934_v19, 2 }
 0x3be   : > { %v921_v22 = vrot.slane %v920_v20, 1  ;;  %v936_v23 = vadd.f32 %v935_v21, %v934_v19 }
 0x3c0   : > { %v922_v25 = vadd.f32 %v921_v22, %v920_v20  ;;  %v937_v26 = vrot.slane %v936_v23, 1 }
 0x3c2   : > { %v923_v28 = vadd.f32 %v922_v25, %v913_v24  ;;  %v938_v29 = vadd.f32 %v937_v26, %v936_v23 }
 0x3c4   : > { %924 = vst [vmem:[#allocation6] sm:$0x1] %v923_v28  ;;  %v939_v30 = vadd.f32 %v938_v29, %v925_v27 }
 0x3c6   : > { %940 = vst [vmem:[#allocation7] sm:$0x1] %v939_v30 }
 0x3c7 PF: > { %p1200_p12 = scmp.ne.s32.totalorder %s1759_s25, 3 }
 0x3c8   : > { %s1201_s5 = sshll.u32 (!%p1200_p12), %s1755_s24, 5 }
 0x3c9   : > { %944 = sbr.rel (%p1200_p12) target bundleno = 1029 (0x405), region = 80  ;;  %s960_s4 = scalar_lea.vmem (!%p1200_p12), [#allocation10], %s1201_s5 }
 0x3ca   : > { %s981_s18 = scalar_lea.vmem (!%p1200_p12), [#allocation11], %s1201_s5 }
 0x3ce   : > { %v947_v31 = vld [vmem:[#allocation6] sm:$0x1]  ;;  %v949_v33 = vld [vmem:[#allocation7] sm:$0x1]  ;;  %v965_v39 = vlaneseq  ;;  %v945_v41 = vld [vmem:[#allocation20 + $0x4] sm:$0x1] }
 0x3cf   : > { %v948_v32 = vmul.f32 0.020833334, %v947_v31  ;;  %v950_v34 = vmul.f32 0.020833334, %v949_v33  ;;  %v946_v44 = vld [vmem:[#allocation20 + $0x5] sm:$0x1] }
 0x3d0   : > { %v966_v40 = vshrl.u32 %v965_v39, 7  ;;  %v961_v46 = vld [vmem:[%s960_s4] sm:$0xff]  ;;  %v962_v47 = vld [vmem:[%s960_s4 + $0x8] sm:$0xff]  ;;  %v963_v48 = vld [vmem:[%s960_s4 + $0x10] sm:$0xff] }
 0x3d1   : > { %v951_v35 = vmul.f32 %v948_v32, %v948_v32  ;;  %v964_v51 = vld [vmem:[%s960_s4 + $0x18] sm:$0xff]  ;;  %v982_v58 = vld [vmem:[%s981_s18] sm:$0xff]  ;;  %v983_v59 = vld [vmem:[%s981_s18 + $0x8] sm:$0xff] }
 0x3d2   : > { %v967_v42 = vsub.s32 0, %v966_v40  ;;  %v984_v60 = vld [vmem:[%s981_s18 + $0x10] sm:$0xff]  ;;  %v985_v1 = vld [vmem:[%s981_s18 + $0x18] sm:$0xff] }
 0x3d3   : > { %v952_v36 = vsub.f32 %v950_v34, %v951_v35 }
 0x3d5   : > { %v953_v37 = vmax.f32 %v952_v36, 0.0 }
 0x3d7   : > { %v954_v38 = vadd.f32 1e-05, %v953_v37 }
 0x3d9   : > { %1501 = vrsqrt.f32 %v954_v38 }
 0x3e6   : > { %v1502_v43 = vpop.eup %1501 }
 0x3e7   : > { %v956_v45 = vmul.f32 %v1502_v43, %v945_v41 }
 0x3e9   : > { %v957_v49 = vmul.f32 %v956_v45, %v948_v32  ;;  %v968_v50 = vrot.slane %v956_v45, %v967_v42 }
 0x3eb   : > { %v958_v52 = vsub.f32 %v946_v44, %v957_v49  ;;  %v969_v53 = vmul.f32 %v968_v50, %v961_v46  ;;  %v970_v54 = vmul.f32 %v968_v50, %v962_v47  ;;  %v971_v55 = vmul.f32 %v968_v50, %v963_v48 }
 0x3ec   : > { %v972_v56 = vmul.f32 %v968_v50, %v964_v51 }
 0x3ed   : > { %v976_v57 = vrot.slane %v958_v52, %v967_v42 }
 0x3ef   : > { %v977_v61 = vadd.f32 %v976_v57, %v969_v53  ;;  %v978_v62 = vadd.f32 %v976_v57, %v970_v54  ;;  %v979_v63 = vadd.f32 %v976_v57, %v971_v55  ;;  %v980_v0 = vadd.f32 %v976_v57, %v972_v56 }
 0x3f1   : > { %v986_v2 = vadd.f32 %v982_v58, %v977_v61  ;;  %v987_v3 = vadd.f32 %v983_v59, %v978_v62  ;;  %v988_v4 = vadd.f32 %v984_v60, %v979_v63  ;;  %v989_v5 = vadd.f32 %v985_v1, %v980_v0 }
 0x3f3   : > { %1503 = vtanh.f32 %v986_v2 }
 0x3f4   : > { %1505 = vtanh.f32 %v987_v3 }
 0x3f5   : > { %1507 = vtanh.f32 %v988_v4 }
 0x3f6   : > { %1509 = vtanh.f32 %v989_v5 }
 0x400   : > { %v1504_v6 = vpop.eup %1503 }
 0x401   : > { %v1506_v7 = vpop.eup %1505  ;;  %994 = vst [vmem:[%s2020_s10] sm:$0xff] %v1504_v6 }
 0x402   : > { %v1508_v8 = vpop.eup %1507  ;;  %995 = vst [vmem:[%s2020_s10 + $0x8] sm:$0xff] %v1506_v7 }
 0x403   : > { %v1510_v9 = vpop.eup %1509  ;;  %996 = vst [vmem:[%s2020_s10 + $0x10] sm:$0xff] %v1508_v8 }
 0x404   : > { %997 = vst [vmem:[%s2020_s10 + $0x18] sm:$0xff] %v1510_v9 }
 0x405 PF: > { %s2158_s26 = sld [smem:[#allocation29_spill]]  ;;  %p1006_p2 = scmp.eq.s32.totalorder %s1759_s25, 3 }
 0x406   : > { %s1014_s27 = sshll.u32 %s2020_s10, 4  ;;  %s2159_s7 = sld [smem:[#allocation36_spill]]  ;;  %s2051_s27 = int_to_ptr.vmem [resolvable:$true] %s1014_s27 }
 0x407   : > { %s2181_s24 = smov (!%p1006_p2, %s1755_s24), 0  ;;  %s2060_s21 = scalar_lea.sflag [#allocation14], %s318_s8 }
 0x408   : > { %s1208_s1 = sshll.u32 %s2181_s24, 9  ;;  %s1643_s14 = scalar_lea.vmem %s2051_s27, 512 }
 0x409   : > { %p1644_p3 = scmp.ne.s32.totalorder %s2051_s27, %s1643_s14  ;;  %s1783_s25 = smov [#allocation21]  }
 0x40a   : > { %s1647_s10 = sshll.u32 %s1783_s25, 4  ;;  %s1648_s10 = int_to_ptr.vmem [resolvable:$false] %s1647_s10 }
 0x40b   : > { %p2160_p5 = scmp.ne.s32.totalorder %s2158_s26, 0  ;;  %s1649_s9 = scalar_lea.vmem %s1648_s10, 1024 }
 0x40c   : > { %s2056_s6 = scalar_lea.hbm %s2159_s7, %s1208_s1  ;;  %p1650_p10 = scmp.lt.s32.totalorder %s2051_s27, %s1648_s10 }
 0x40d   : > { %p1645_p7 = pnand %p1644_p3, %p2160_p5  ;;  %p1651_p0 = scmp.lt.s32.totalorder %s1649_s9, %s1643_s14 }
 0x40f   : > { %p1646_p8 = pneg %p1645_p7  ;;  %p1652_p6 = por %p1651_p0, %p1650_p10 }
 0x411   : > { %p1653_p4 = pnand %p1652_p6, %p1646_p8 }
 0x413   : > { %1656 = shalt.err (!%p1653_p4)
}
 0x414   : > { %s1657_s24 = scalar_lea.hbm %s2056_s6, 512  ;;  %s1661_s15 = scalar_lea.hbm %s2159_s7, 1024 }
 0x415   : > { %p1658_p11 = scmp.ne.s32.totalorder %s2056_s6, %s1657_s24  ;;  %p1662_p9 = scmp.lt.s32.totalorder %s2056_s6, %s2159_s7 }
 0x416   : > { %p1663_p12 = scmp.lt.s32.totalorder %s1661_s15, %s1657_s24 }
 0x417   : > { %p1659_p1 = pnand %p1658_p11, %p2160_p5 }
 0x418   : > { %p1664_p2 = por %p1663_p12, %p1662_p9 }
 0x419   : > { %p1660_p13 = pneg %p1659_p1 }
 0x41b   : > { %p1665_p3 = pnand %p1664_p2, %p1660_p13 }
 0x41d   : > { %1668 = shalt.err (!%p1665_p3)
}
 0x41e   : > { %s1784_s12 = smov 128   ;;  %s1785_s5 = smov 8  }
 0x41f   : > { %1317 = dma.vmem_to_hbm [thread:$0]  (%p2160_p5), %s2051_s27, 512, %s2056_s6, %s2060_s21, %s1784_s12, %s1784_s12, %s1785_s5  }
 0x420 PF: > { %s2161_s4 = sld [smem:[#allocation26_spill]]  ;;  %p1349_p7 = scmp.ge.s32.totalorder %s1771_s28, 2 }
 0x421   : > { %s2162_s18 = sld [smem:[#allocation30_spill]] }
 0x426   : > { %s1029_s1 = sand.u32 1, %s2161_s4  }
 0x427   : > { %p2163_p8 = scmp.ne.s32.totalorder %s2162_s18, 0  ;;  %s1030_s30 = scalar_lea.sflag [#allocation14], %s1029_s1 }
 0x429   : > { %p1337_p10 = pnand %p1349_p7, %p2163_p8 }
 0x42b   : > { %p1338_p0 = pneg %p1337_p10 }
 0x42d   : > { %1726 = dma.done.wait (%p1338_p0), %s1030_s30, 512  }
 0x42e   : > { %1728 = vsyncadd (%p1338_p0), %s1030_s30, 4294966784  ;;  %s23_s28 = sadd.s32 1, %s1771_s28   ;;  %s2164_s24 = sld [smem:[#allocation27_spill]] }
 0x42f   : > { %p20_p6 = scmp.ge.s32.totalorder %s23_s28, 10   ;;  %s2165_s25 = sld [smem:[#allocation28_spill]] }
 0x430   : > { %s2166_s27 = sld [smem:[#allocation31_spill]]  ;;  %s2167_s18 = smov %s1735_s19 }
 0x431   : > { %s2168_s19 = smov %s1739_s20  ;;  %s2169_s20 = smov %s1981_s3 }
 0x432   : > { %s2170_s21 = smov %s1747_s22  ;;  %s2171_s22 = smov %s1751_s23 }
 0x433   : > { %s2172_s23 = smov %s1978_s2  ;;  %s2173_s26 = smov %s2175_s17 }
 0x434   :  { %22 = sbr.rel (!%p20_p6) target bundleno = 17 (0x11), region = 129 }
 0x439   :  { %1035 = vsyncpa [#allocation13], 1 }
 0x43a   :  { %1037 = vsyncpa [#allocation13 + $0x1], 1 }
 0x43b   :  { %1038 = vsyncpa [#allocation16], 1 }
 0x43c   :  { %1039 = vsyncpa [#allocation19], 1 }
 0x43d   :  { %1040 = vsyncpa [#allocation14], 1 }
 0x43e   :  { %1042 = vsyncpa [#allocation14 + $0x1], 1 }

</bundles_post_ra>
